<compile_context>
chip_gen: v7x
topology: tpu7x:2x2x1
jax: 0.10.0
libtpu: 0.0.40
codegen_flags: <defaults>
</compile_context>

<pallas_src>
import math

import jax
import jax.numpy as jnp
from jax.experimental import pallas as pl

# ---- model hyperparameters (small, consistent with the module) ----
B = 2            # batch
S = 8            # sequence length
D_MODEL = 32     # d_model
N_HEAD = 4       # n_head
D_HEAD = D_MODEL // N_HEAD
FFN_HIDDEN = 64  # ffn_hidden
N_LAYER = 2      # n_layer
VOCAB = 64       # vocab_size
EPS = 1e-10


def _layer_norm(v, gamma, beta):
    # Matches the reference LayerNorm: mean / biased var, clamp(var, eps), sqrt(var + eps).
    mean = jnp.mean(v, axis=-1, keepdims=True)
    var = jnp.mean((v - mean) ** 2, axis=-1, keepdims=True)   # unbiased=False
    var = jnp.maximum(var, EPS)                               # torch.clamp(var, min=eps)
    return gamma * (v - mean) * jax.lax.rsqrt(var + EPS) + beta


def encoder_kernel(ids_ref, pos_ref, mask_ref, emb_ref,
                   wqkv_ref, bqkv_ref, wo_ref, bo_ref,
                   w1_ref, b1_ref, w2_ref, b2_ref, ln_ref,
                   o_ref):
    BS = ids_ref.shape[0]
    V, D = emb_ref.shape

    # ---- TransformerEmbedding: token gather as a one-hot matmul + positional encoding ----
    ids = ids_ref[...]                                            # (BS, 1) int32
    vocab_iota = jax.lax.broadcasted_iota(jnp.int32, (BS, V), 1)  # lane iota over vocab
    onehot = (vocab_iota == ids).astype(jnp.float32)              # (BS, V)
    x = jnp.dot(onehot, emb_ref[...], preferred_element_type=jnp.float32)
    x = x + pos_ref[...]                                          # (BS, D); emb dropout = identity

    # ---- hoisted mask term: compare + broadcast emitted ONCE for all layers/heads ----
    mask_is_pad = jnp.broadcast_to(mask_ref[...] == 0.0, (B, S, S))   # True where padded

    for l in range(N_LAYER):                                      # static unroll over layers
        wqkv = wqkv_ref[l]; bqkv = bqkv_ref[l]                    # Q columns pre-scaled
        wo = wo_ref[l]                                            # (H, dh, D) per-head blocks
        bo = bo_ref[l]
        w1 = w1_ref[l];     b1 = b1_ref[l]
        w2 = w2_ref[l];     b2 = b2_ref[l]
        ln = ln_ref[l]                                            # (4, D): g1, b1, g2, b2

        # ---- Multi-head attention (q = k = v = x) ----
        # Fused QKV projection over the whole (B*S, D) slab: one MXU push, N = 3*D lanes.
        qkv = jnp.dot(x, wqkv, preferred_element_type=jnp.float32) + bqkv   # (BS, 3D)
        qkv3 = qkv.reshape(B, S, 3 * D)                                     # leading-dim reshape

        attn = None
        for h in range(N_HEAD):                                   # static unroll, batched over B
            lo = h * D_HEAD
            qh = qkv3[:, :, lo:lo + D_HEAD]                       # (B, S, dh)
            kh = qkv3[:, :, D + lo:D + lo + D_HEAD]
            vh = qkv3[:, :, 2 * D + lo:2 * D + lo + D_HEAD]
            s = jnp.einsum('bqd,bkd->bqk', qh, kh,
                           preferred_element_type=jnp.float32)    # (B, S, S); scale pre-folded
            s = jnp.where(mask_is_pad, -10000.0, s)               # key-padding masked_fill
            s = s - jnp.max(s, axis=-1, keepdims=True)            # stable softmax
            p = jnp.exp(s)
            p = p * pl.reciprocal(jnp.sum(p, axis=-1, keepdims=True), approx=False)
            ctx = jnp.einsum('bqk,bkd->bqd', p, vh,
                             preferred_element_type=jnp.float32)  # (B, S, dh)
            # Head merge folded into the output projection: accumulate ctx_h @ Wo_h
            # instead of concatenating heads along lanes and doing one (D,D) matmul.
            part = jnp.dot(ctx.reshape(BS, D_HEAD), wo[h],
                           preferred_element_type=jnp.float32)    # (BS, D)
            attn = part if attn is None else attn + part
        attn = attn + bo

        # drop1 identity; residual + norm1
        x = _layer_norm(attn + x, ln[0:1, :], ln[1:2, :])

        # ---- Position-wise feed-forward (inner dropout identity) ----
        hid = jnp.maximum(jnp.dot(x, w1, preferred_element_type=jnp.float32) + b1, 0.0)
        ffn = jnp.dot(hid, w2, preferred_element_type=jnp.float32) + b2

        # drop2 identity; residual + norm2
        x = _layer_norm(ffn + x, ln[2:3, :], ln[3:4, :])

    o_ref[...] = x.astype(o_ref.dtype)


def encoder_forward(token_ids, pad_mask, params):
    """Full Encoder forward. token_ids: (B, S) int32, pad_mask: (B, S) 1/0."""
    Bx, Sx = token_ids.shape
    ids2d = token_ids.reshape(Bx * Sx, 1).astype(jnp.int32)
    pos = jnp.tile(params["pos_enc"][:Sx], (Bx, 1))               # (B*S, D) positional table
    mask_keep = pad_mask.reshape(Bx, 1, Sx).astype(jnp.float32)   # key-padding mask

    args = (ids2d, pos, mask_keep, params["emb"],
            params["wqkv"], params["bqkv"], params["wo"], params["bo"],
            params["w1"], params["b1"], params["w2"], params["b2"], params["ln"])

    flops = int(
        2 * Bx * Sx * VOCAB * D_MODEL                               # embedding gather matmul
        + N_LAYER * (2 * Bx * Sx * D_MODEL * 3 * D_MODEL            # fused QKV
                     + 4 * Bx * N_HEAD * Sx * Sx * D_HEAD           # scores + PV
                     + 2 * Bx * Sx * D_MODEL * D_MODEL              # per-head output projection
                     + 4 * Bx * Sx * D_MODEL * FFN_HIDDEN))         # FFN
    transcendentals = int(N_LAYER * (Bx * N_HEAD * Sx * Sx + 2 * Bx * Sx))
    bytes_accessed = int(sum(int(a.size) * a.dtype.itemsize for a in args)
                         + Bx * Sx * D_MODEL * 4)

    # Grid-less: whole problem fits a single kernel invocation on one TensorCore.
    # (No vmem_limit override — working set is <200 KB, defaults are fine.)
    out2d = pl.pallas_call(
        encoder_kernel,
        out_shape=jax.ShapeDtypeStruct((Bx * Sx, D_MODEL), jnp.float32),
        cost_estimate=pl.CostEstimate(flops=flops,
                                      transcendentals=transcendentals,
                                      bytes_accessed=bytes_accessed),
    )(*args)
    return out2d.reshape(Bx, Sx, D_MODEL)


def init_params(key):
    keys = jax.random.split(key, 1 + 4 * N_LAYER)
    scale = 0.02
    inv_scale = 1.0 / math.sqrt(D_HEAD)

    def lin(k, fan_in, fan_out):
        # weights stored as (in, out) so the kernel computes y = x @ W + b
        w = scale * jax.random.normal(k, (fan_in, fan_out), jnp.float32)
        b = jnp.zeros((1, fan_out), jnp.float32)
        return w, b

    emb = scale * jax.random.normal(keys[0], (VOCAB, D_MODEL), jnp.float32)

    # Fold 1/sqrt(d_head) into the Q part (weight AND bias) of the fused QKV projection.
    qkv_colscale = jnp.concatenate(
        [jnp.full((D_MODEL,), inv_scale, jnp.float32),
         jnp.ones((2 * D_MODEL,), jnp.float32)])[None, :]          # (1, 3D)

    wqkv, bqkv, wo, bo, w1, b1, w2, b2, ln = ([] for _ in range(9))
    ki = 1
    for _ in range(N_LAYER):
        w, b = lin(keys[ki], D_MODEL, 3 * D_MODEL); ki += 1        # fused Wq|Wk|Wv
        wqkv.append(w * qkv_colscale); bqkv.append(b * qkv_colscale)
        w, b = lin(keys[ki], D_MODEL, D_MODEL); ki += 1            # Wo -> per-head blocks
        wo.append(w.reshape(N_HEAD, D_HEAD, D_MODEL)); bo.append(b)
        w, b = lin(keys[ki], D_MODEL, FFN_HIDDEN); ki += 1
        w1.append(w); b1.append(b)
        w, b = lin(keys[ki], FFN_HIDDEN, D_MODEL); ki += 1
        w2.append(w); b2.append(b)
        ln.append(jnp.concatenate([jnp.ones((1, D_MODEL)), jnp.zeros((1, D_MODEL)),
                                   jnp.ones((1, D_MODEL)), jnp.zeros((1, D_MODEL))],
                                  axis=0).astype(jnp.float32))     # (4, D): g1,b1,g2,b2

    # Sinusoidal positional encoding, exactly as PositionalEmbedding builds it.
    pos = jnp.arange(S, dtype=jnp.float32)[:, None]
    ind = jnp.arange(0, D_MODEL, 2, dtype=jnp.float32)
    angle = pos / jnp.power(10000.0, ind / D_MODEL)
    enc = jnp.zeros((S, D_MODEL), jnp.float32)
    enc = enc.at[:, 0::2].set(jnp.sin(angle))
    enc = enc.at[:, 1::2].set(jnp.cos(angle))

    stack = lambda xs: jnp.stack(xs, axis=0)
    return dict(emb=emb, pos_enc=enc,
                wqkv=stack(wqkv), bqkv=stack(bqkv), wo=stack(wo), bo=stack(bo),
                w1=stack(w1), b1=stack(b1), w2=stack(w2), b2=stack(b2), ln=stack(ln))


if __name__ == "__main__":
    key = jax.random.PRNGKey(0)
    k_ids, k_params = jax.random.split(key)
    token_ids = jax.random.randint(k_ids, (B, S), 0, VOCAB, dtype=jnp.int32)
    pad_mask = jnp.ones((B, S), jnp.float32)     # no padding in the demo
    params = init_params(k_params)

    out = encoder_forward(token_ids, pad_mask, params)
    out = jax.block_until_ready(out)
    assert out.shape == (B, S, D_MODEL)
    assert bool(jnp.all(jnp.isfinite(out)))
    print("KERNEL_OK")
</pallas_src>

<mosaic_0001>
module attributes {stable_mosaic.version = 11 : i64} {
  func.func @encoder_kernel(%arg0: memref<16x1xi32, #tpu.memory_space<vmem>>, %arg1: memref<16x32xf32, #tpu.memory_space<vmem>>, %arg2: memref<2x1x8xf32, #tpu.memory_space<vmem>>, %arg3: memref<64x32xf32, #tpu.memory_space<vmem>>, %arg4: memref<2x32x96xf32, #tpu.memory_space<vmem>>, %arg5: memref<2x1x96xf32, #tpu.memory_space<vmem>>, %arg6: memref<2x4x8x32xf32, #tpu.memory_space<vmem>>, %arg7: memref<2x1x32xf32, #tpu.memory_space<vmem>>, %arg8: memref<2x32x64xf32, #tpu.memory_space<vmem>>, %arg9: memref<2x1x64xf32, #tpu.memory_space<vmem>>, %arg10: memref<2x64x32xf32, #tpu.memory_space<vmem>>, %arg11: memref<2x1x32xf32, #tpu.memory_space<vmem>>, %arg12: memref<2x4x32xf32, #tpu.memory_space<vmem>>, %arg13: memref<16x32xf32, #tpu.memory_space<vmem>>) attributes {dimension_semantics = [], scalar_prefetch = 0 : i64, scratch_operands = 0 : i64, tpu.core_type = #tpu.core_type<tc>} {
    %c0 = arith.constant 0 : index
    %c0_0 = arith.constant 0 : index
    %0 = vector.load %arg0[%c0, %c0_0] : memref<16x1xi32, #tpu.memory_space<vmem>>, vector<16x1xi32>
    %1 = tpu.iota {dimensions = array<i32: 1>} : vector<16x64xi32>
    %2 = vector.broadcast %0 : vector<16x1xi32> to vector<16x64xi32>
    %3 = arith.cmpi eq, %1, %2 : vector<16x64xi32>
    %4 = arith.extui %3 : vector<16x64xi1> to vector<16x64xi32>
    %5 = arith.sitofp %4 : vector<16x64xi32> to vector<16x64xf32>
    %c0_1 = arith.constant 0 : index
    %c0_2 = arith.constant 0 : index
    %6 = vector.load %arg3[%c0_1, %c0_2] : memref<64x32xf32, #tpu.memory_space<vmem>>, vector<64x32xf32>
    %cst = arith.constant dense<0.000000e+00> : vector<16x32xf32>
    %7 = tpu.matmul %5, %6, %cst {dimension_numbers = #tpu.dot_dimension_numbers<[1], [0], [0], [1], [0, 0, 1, 1], [], []>} : vector<16x64xf32>, vector<64x32xf32>, vector<16x32xf32> -> vector<16x32xf32>
    %c0_3 = arith.constant 0 : index
    %c0_4 = arith.constant 0 : index
    %8 = vector.load %arg1[%c0_3, %c0_4] : memref<16x32xf32, #tpu.memory_space<vmem>>, vector<16x32xf32>
    %9 = arith.addf %7, %8 : vector<16x32xf32>
    %c0_5 = arith.constant 0 : index
    %c0_6 = arith.constant 0 : index
    %c0_7 = arith.constant 0 : index
    %10 = vector.load %arg2[%c0_5, %c0_6, %c0_7] : memref<2x1x8xf32, #tpu.memory_space<vmem>>, vector<2x1x8xf32>
    %cst_8 = arith.constant 0.000000e+00 : f32
    %11 = vector.broadcast %cst_8 : f32 to vector<2x1x8xf32>
    %12 = arith.cmpf oeq, %10, %11 : vector<2x1x8xf32>
    %13 = vector.shape_cast %12 : vector<2x1x8xi1> to vector<2x1x8xi1>
    %14 = vector.broadcast %13 : vector<2x1x8xi1> to vector<2x8x8xi1>
    %c0_9 = arith.constant 0 : index
    %c0_10 = arith.constant 0 : index
    %c0_11 = arith.constant 0 : index
    %15 = vector.load %arg4[%c0_9, %c0_10, %c0_11] : memref<2x32x96xf32, #tpu.memory_space<vmem>>, vector<1x32x96xf32>
    %16 = vector.shape_cast %15 : vector<1x32x96xf32> to vector<32x96xf32>
    %c0_12 = arith.constant 0 : index
    %c0_13 = arith.constant 0 : index
    %c0_14 = arith.constant 0 : index
    %17 = vector.load %arg5[%c0_12, %c0_13, %c0_14] : memref<2x1x96xf32, #tpu.memory_space<vmem>>, vector<1x1x96xf32>
    %18 = vector.shape_cast %17 : vector<1x1x96xf32> to vector<1x96xf32>
    %c0_15 = arith.constant 0 : index
    %c0_16 = arith.constant 0 : index
    %c0_17 = arith.constant 0 : index
    %c0_18 = arith.constant 0 : index
    %19 = vector.load %arg6[%c0_15, %c0_16, %c0_17, %c0_18] : memref<2x4x8x32xf32, #tpu.memory_space<vmem>>, vector<1x4x8x32xf32>
    %20 = vector.shape_cast %19 : vector<1x4x8x32xf32> to vector<4x8x32xf32>
    %c0_19 = arith.constant 0 : index
    %c0_20 = arith.constant 0 : index
    %c0_21 = arith.constant 0 : index
    %21 = vector.load %arg7[%c0_19, %c0_20, %c0_21] : memref<2x1x32xf32, #tpu.memory_space<vmem>>, vector<1x1x32xf32>
    %22 = vector.shape_cast %21 : vector<1x1x32xf32> to vector<1x32xf32>
    %c0_22 = arith.constant 0 : index
    %c0_23 = arith.constant 0 : index
    %c0_24 = arith.constant 0 : index
    %23 = vector.load %arg8[%c0_22, %c0_23, %c0_24] : memref<2x32x64xf32, #tpu.memory_space<vmem>>, vector<1x32x64xf32>
    %24 = vector.shape_cast %23 : vector<1x32x64xf32> to vector<32x64xf32>
    %c0_25 = arith.constant 0 : index
    %c0_26 = arith.constant 0 : index
    %c0_27 = arith.constant 0 : index
    %25 = vector.load %arg9[%c0_25, %c0_26, %c0_27] : memref<2x1x64xf32, #tpu.memory_space<vmem>>, vector<1x1x64xf32>
    %26 = vector.shape_cast %25 : vector<1x1x64xf32> to vector<1x64xf32>
    %c0_28 = arith.constant 0 : index
    %c0_29 = arith.constant 0 : index
    %c0_30 = arith.constant 0 : index
    %27 = vector.load %arg10[%c0_28, %c0_29, %c0_30] : memref<2x64x32xf32, #tpu.memory_space<vmem>>, vector<1x64x32xf32>
    %28 = vector.shape_cast %27 : vector<1x64x32xf32> to vector<64x32xf32>
    %c0_31 = arith.constant 0 : index
    %c0_32 = arith.constant 0 : index
    %c0_33 = arith.constant 0 : index
    %29 = vector.load %arg11[%c0_31, %c0_32, %c0_33] : memref<2x1x32xf32, #tpu.memory_space<vmem>>, vector<1x1x32xf32>
    %30 = vector.shape_cast %29 : vector<1x1x32xf32> to vector<1x32xf32>
    %c0_34 = arith.constant 0 : index
    %c0_35 = arith.constant 0 : index
    %c0_36 = arith.constant 0 : index
    %31 = vector.load %arg12[%c0_34, %c0_35, %c0_36] : memref<2x4x32xf32, #tpu.memory_space<vmem>>, vector<1x4x32xf32>
    %32 = vector.shape_cast %31 : vector<1x4x32xf32> to vector<4x32xf32>
    %cst_37 = arith.constant dense<0.000000e+00> : vector<16x96xf32>
    %33 = tpu.matmul %9, %16, %cst_37 {dimension_numbers = #tpu.dot_dimension_numbers<[1], [0], [0], [1], [0, 0, 1, 1], [], []>} : vector<16x32xf32>, vector<32x96xf32>, vector<16x96xf32> -> vector<16x96xf32>
    %34 = vector.broadcast %18 : vector<1x96xf32> to vector<16x96xf32>
    %35 = arith.addf %33, %34 : vector<16x96xf32>
    %36 = vector.shape_cast %35 : vector<16x96xf32> to vector<2x8x96xf32>
    %37 = vector.extract_strided_slice %36 {offsets = [0, 0, 0], sizes = [2, 8, 8], strides = [1, 1, 1]} : vector<2x8x96xf32> to vector<2x8x8xf32>
    %38 = vector.extract_strided_slice %36 {offsets = [0, 0, 32], sizes = [2, 8, 8], strides = [1, 1, 1]} : vector<2x8x96xf32> to vector<2x8x8xf32>
    %39 = vector.extract_strided_slice %36 {offsets = [0, 0, 64], sizes = [2, 8, 8], strides = [1, 1, 1]} : vector<2x8x96xf32> to vector<2x8x8xf32>
    "tpu.trace_start"() <{level = 10 : i32, message = "bqd,bkd->bqk"}> : () -> ()
    %cst_38 = arith.constant dense<0.000000e+00> : vector<2x8x8xf32>
    %40 = tpu.matmul %37, %38, %cst_38 {dimension_numbers = #tpu.dot_dimension_numbers<[2], [2], [1], [1], [0, 0, 0, 1, 1, 1], [0], [0]>} : vector<2x8x8xf32>, vector<2x8x8xf32>, vector<2x8x8xf32> -> vector<2x8x8xf32>
    %cst_39 = arith.constant -1.000000e+04 : f32
    "tpu.trace_stop"() : () -> ()
    %41 = vector.broadcast %cst_39 : f32 to vector<2x8x8xf32>
    %42 = arith.select %14, %41, %40 : vector<2x8x8xi1>, vector<2x8x8xf32>
    %cst_40 = arith.constant dense<0xFF800000> : vector<2x8xf32>
    %43 = vector.multi_reduction <maximumf>, %42, %cst_40 [2] : vector<2x8x8xf32> to vector<2x8xf32>
    %44 = vector.shape_cast %43 : vector<2x8xf32> to vector<2x8x1xf32>
    %45 = vector.broadcast %44 : vector<2x8x1xf32> to vector<2x8x8xf32>
    %46 = arith.subf %42, %45 : vector<2x8x8xf32>
    %47 = math.exp %46 : vector<2x8x8xf32>
    %cst_41 = arith.constant dense<0.000000e+00> : vector<2x8xf32>
    %48 = vector.multi_reduction <add>, %47, %cst_41 [2] : vector<2x8x8xf32> to vector<2x8xf32>
    %49 = vector.shape_cast %48 : vector<2x8xf32> to vector<2x8x1xf32>
    %50 = tpu.reciprocal %49 : vector<2x8x1xf32> -> vector<2x8x1xf32>
    %51 = vector.broadcast %50 : vector<2x8x1xf32> to vector<2x8x8xf32>
    %52 = arith.mulf %47, %51 : vector<2x8x8xf32>
    "tpu.trace_start"() <{level = 10 : i32, message = "bqk,bkd->bqd"}> : () -> ()
    %cst_42 = arith.constant dense<0.000000e+00> : vector<2x8x8xf32>
    %53 = tpu.matmul %52, %39, %cst_42 {dimension_numbers = #tpu.dot_dimension_numbers<[2], [1], [1], [2], [0, 0, 0, 1, 1, 2], [0], [0]>} : vector<2x8x8xf32>, vector<2x8x8xf32>, vector<2x8x8xf32> -> vector<2x8x8xf32>
    "tpu.trace_stop"() : () -> ()
    %54 = vector.shape_cast %53 : vector<2x8x8xf32> to vector<16x8xf32>
    %55 = vector.extract_strided_slice %20 {offsets = [0, 0, 0], sizes = [1, 8, 32], strides = [1, 1, 1]} : vector<4x8x32xf32> to vector<1x8x32xf32>
    %56 = vector.shape_cast %55 : vector<1x8x32xf32> to vector<8x32xf32>
    %cst_43 = arith.constant dense<0.000000e+00> : vector<16x32xf32>
    %57 = tpu.matmul %54, %56, %cst_43 {dimension_numbers = #tpu.dot_dimension_numbers<[1], [0], [0], [1], [0, 0, 1, 1], [], []>} : vector<16x8xf32>, vector<8x32xf32>, vector<16x32xf32> -> vector<16x32xf32>
    %58 = vector.extract_strided_slice %36 {offsets = [0, 0, 8], sizes = [2, 8, 8], strides = [1, 1, 1]} : vector<2x8x96xf32> to vector<2x8x8xf32>
    %59 = vector.extract_strided_slice %36 {offsets = [0, 0, 40], sizes = [2, 8, 8], strides = [1, 1, 1]} : vector<2x8x96xf32> to vector<2x8x8xf32>
    %60 = vector.extract_strided_slice %36 {offsets = [0, 0, 72], sizes = [2, 8, 8], strides = [1, 1, 1]} : vector<2x8x96xf32> to vector<2x8x8xf32>
    "tpu.trace_start"() <{level = 10 : i32, message = "bqd,bkd->bqk"}> : () -> ()
    %cst_44 = arith.constant dense<0.000000e+00> : vector<2x8x8xf32>
    %61 = tpu.matmul %58, %59, %cst_44 {dimension_numbers = #tpu.dot_dimension_numbers<[2], [2], [1], [1], [0, 0, 0, 1, 1, 1], [0], [0]>} : vector<2x8x8xf32>, vector<2x8x8xf32>, vector<2x8x8xf32> -> vector<2x8x8xf32>
    %cst_45 = arith.constant -1.000000e+04 : f32
    "tpu.trace_stop"() : () -> ()
    %62 = vector.broadcast %cst_45 : f32 to vector<2x8x8xf32>
    %63 = arith.select %14, %62, %61 : vector<2x8x8xi1>, vector<2x8x8xf32>
    %cst_46 = arith.constant dense<0xFF800000> : vector<2x8xf32>
    %64 = vector.multi_reduction <maximumf>, %63, %cst_46 [2] : vector<2x8x8xf32> to vector<2x8xf32>
    %65 = vector.shape_cast %64 : vector<2x8xf32> to vector<2x8x1xf32>
    %66 = vector.broadcast %65 : vector<2x8x1xf32> to vector<2x8x8xf32>
    %67 = arith.subf %63, %66 : vector<2x8x8xf32>
    %68 = math.exp %67 : vector<2x8x8xf32>
    %cst_47 = arith.constant dense<0.000000e+00> : vector<2x8xf32>
    %69 = vector.multi_reduction <add>, %68, %cst_47 [2] : vector<2x8x8xf32> to vector<2x8xf32>
    %70 = vector.shape_cast %69 : vector<2x8xf32> to vector<2x8x1xf32>
    %71 = tpu.reciprocal %70 : vector<2x8x1xf32> -> vector<2x8x1xf32>
    %72 = vector.broadcast %71 : vector<2x8x1xf32> to vector<2x8x8xf32>
    %73 = arith.mulf %68, %72 : vector<2x8x8xf32>
    "tpu.trace_start"() <{level = 10 : i32, message = "bqk,bkd->bqd"}> : () -> ()
    %cst_48 = arith.constant dense<0.000000e+00> : vector<2x8x8xf32>
    %74 = tpu.matmul %73, %60, %cst_48 {dimension_numbers = #tpu.dot_dimension_numbers<[2], [1], [1], [2], [0, 0, 0, 1, 1, 2], [0], [0]>} : vector<2x8x8xf32>, vector<2x8x8xf32>, vector<2x8x8xf32> -> vector<2x8x8xf32>
    "tpu.trace_stop"() : () -> ()
    %75 = vector.shape_cast %74 : vector<2x8x8xf32> to vector<16x8xf32>
    %76 = vector.extract_strided_slice %20 {offsets = [1, 0, 0], sizes = [1, 8, 32], strides = [1, 1, 1]} : vector<4x8x32xf32> to vector<1x8x32xf32>
    %77 = vector.shape_cast %76 : vector<1x8x32xf32> to vector<8x32xf32>
    %cst_49 = arith.constant dense<0.000000e+00> : vector<16x32xf32>
    %78 = tpu.matmul %75, %77, %cst_49 {dimension_numbers = #tpu.dot_dimension_numbers<[1], [0], [0], [1], [0, 0, 1, 1], [], []>} : vector<16x8xf32>, vector<8x32xf32>, vector<16x32xf32> -> vector<16x32xf32>
    %79 = arith.addf %57, %78 : vector<16x32xf32>
    %80 = vector.extract_strided_slice %36 {offsets = [0, 0, 16], sizes = [2, 8, 8], strides = [1, 1, 1]} : vector<2x8x96xf32> to vector<2x8x8xf32>
    %81 = vector.extract_strided_slice %36 {offsets = [0, 0, 48], sizes = [2, 8, 8], strides = [1, 1, 1]} : vector<2x8x96xf32> to vector<2x8x8xf32>
    %82 = vector.extract_strided_slice %36 {offsets = [0, 0, 80], sizes = [2, 8, 8], strides = [1, 1, 1]} : vector<2x8x96xf32> to vector<2x8x8xf32>
    "tpu.trace_start"() <{level = 10 : i32, message = "bqd,bkd->bqk"}> : () -> ()
    %cst_50 = arith.constant dense<0.000000e+00> : vector<2x8x8xf32>
    %83 = tpu.matmul %80, %81, %cst_50 {dimension_numbers = #tpu.dot_dimension_numbers<[2], [2], [1], [1], [0, 0, 0, 1, 1, 1], [0], [0]>} : vector<2x8x8xf32>, vector<2x8x8xf32>, vector<2x8x8xf32> -> vector<2x8x8xf32>
    %cst_51 = arith.constant -1.000000e+04 : f32
    "tpu.trace_stop"() : () -> ()
    %84 = vector.broadcast %cst_51 : f32 to vector<2x8x8xf32>
    %85 = arith.select %14, %84, %83 : vector<2x8x8xi1>, vector<2x8x8xf32>
    %cst_52 = arith.constant dense<0xFF800000> : vector<2x8xf32>
    %86 = vector.multi_reduction <maximumf>, %85, %cst_52 [2] : vector<2x8x8xf32> to vector<2x8xf32>
    %87 = vector.shape_cast %86 : vector<2x8xf32> to vector<2x8x1xf32>
    %88 = vector.broadcast %87 : vector<2x8x1xf32> to vector<2x8x8xf32>
    %89 = arith.subf %85, %88 : vector<2x8x8xf32>
    %90 = math.exp %89 : vector<2x8x8xf32>
    %cst_53 = arith.constant dense<0.000000e+00> : vector<2x8xf32>
    %91 = vector.multi_reduction <add>, %90, %cst_53 [2] : vector<2x8x8xf32> to vector<2x8xf32>
    %92 = vector.shape_cast %91 : vector<2x8xf32> to vector<2x8x1xf32>
    %93 = tpu.reciprocal %92 : vector<2x8x1xf32> -> vector<2x8x1xf32>
    %94 = vector.broadcast %93 : vector<2x8x1xf32> to vector<2x8x8xf32>
    %95 = arith.mulf %90, %94 : vector<2x8x8xf32>
    "tpu.trace_start"() <{level = 10 : i32, message = "bqk,bkd->bqd"}> : () -> ()
    %cst_54 = arith.constant dense<0.000000e+00> : vector<2x8x8xf32>
    %96 = tpu.matmul %95, %82, %cst_54 {dimension_numbers = #tpu.dot_dimension_numbers<[2], [1], [1], [2], [0, 0, 0, 1, 1, 2], [0], [0]>} : vector<2x8x8xf32>, vector<2x8x8xf32>, vector<2x8x8xf32> -> vector<2x8x8xf32>
    "tpu.trace_stop"() : () -> ()
    %97 = vector.shape_cast %96 : vector<2x8x8xf32> to vector<16x8xf32>
    %98 = vector.extract_strided_slice %20 {offsets = [2, 0, 0], sizes = [1, 8, 32], strides = [1, 1, 1]} : vector<4x8x32xf32> to vector<1x8x32xf32>
    %99 = vector.shape_cast %98 : vector<1x8x32xf32> to vector<8x32xf32>
    %cst_55 = arith.constant dense<0.000000e+00> : vector<16x32xf32>
    %100 = tpu.matmul %97, %99, %cst_55 {dimension_numbers = #tpu.dot_dimension_numbers<[1], [0], [0], [1], [0, 0, 1, 1], [], []>} : vector<16x8xf32>, vector<8x32xf32>, vector<16x32xf32> -> vector<16x32xf32>
    %101 = arith.addf %79, %100 : vector<16x32xf32>
    %102 = vector.extract_strided_slice %36 {offsets = [0, 0, 24], sizes = [2, 8, 8], strides = [1, 1, 1]} : vector<2x8x96xf32> to vector<2x8x8xf32>
    %103 = vector.extract_strided_slice %36 {offsets = [0, 0, 56], sizes = [2, 8, 8], strides = [1, 1, 1]} : vector<2x8x96xf32> to vector<2x8x8xf32>
    %104 = vector.extract_strided_slice %36 {offsets = [0, 0, 88], sizes = [2, 8, 8], strides = [1, 1, 1]} : vector<2x8x96xf32> to vector<2x8x8xf32>
    "tpu.trace_start"() <{level = 10 : i32, message = "bqd,bkd->bqk"}> : () -> ()
    %cst_56 = arith.constant dense<0.000000e+00> : vector<2x8x8xf32>
    %105 = tpu.matmul %102, %103, %cst_56 {dimension_numbers = #tpu.dot_dimension_numbers<[2], [2], [1], [1], [0, 0, 0, 1, 1, 1], [0], [0]>} : vector<2x8x8xf32>, vector<2x8x8xf32>, vector<2x8x8xf32> -> vector<2x8x8xf32>
    %cst_57 = arith.constant -1.000000e+04 : f32
    "tpu.trace_stop"() : () -> ()
    %106 = vector.broadcast %cst_57 : f32 to vector<2x8x8xf32>
    %107 = arith.select %14, %106, %105 : vector<2x8x8xi1>, vector<2x8x8xf32>
    %cst_58 = arith.constant dense<0xFF800000> : vector<2x8xf32>
    %108 = vector.multi_reduction <maximumf>, %107, %cst_58 [2] : vector<2x8x8xf32> to vector<2x8xf32>
    %109 = vector.shape_cast %108 : vector<2x8xf32> to vector<2x8x1xf32>
    %110 = vector.broadcast %109 : vector<2x8x1xf32> to vector<2x8x8xf32>
    %111 = arith.subf %107, %110 : vector<2x8x8xf32>
    %112 = math.exp %111 : vector<2x8x8xf32>
    %cst_59 = arith.constant dense<0.000000e+00> : vector<2x8xf32>
    %113 = vector.multi_reduction <add>, %112, %cst_59 [2] : vector<2x8x8xf32> to vector<2x8xf32>
    %114 = vector.shape_cast %113 : vector<2x8xf32> to vector<2x8x1xf32>
    %115 = tpu.reciprocal %114 : vector<2x8x1xf32> -> vector<2x8x1xf32>
    %116 = vector.broadcast %115 : vector<2x8x1xf32> to vector<2x8x8xf32>
    %117 = arith.mulf %112, %116 : vector<2x8x8xf32>
    "tpu.trace_start"() <{level = 10 : i32, message = "bqk,bkd->bqd"}> : () -> ()
    %cst_60 = arith.constant dense<0.000000e+00> : vector<2x8x8xf32>
    %118 = tpu.matmul %117, %104, %cst_60 {dimension_numbers = #tpu.dot_dimension_numbers<[2], [1], [1], [2], [0, 0, 0, 1, 1, 2], [0], [0]>} : vector<2x8x8xf32>, vector<2x8x8xf32>, vector<2x8x8xf32> -> vector<2x8x8xf32>
    "tpu.trace_stop"() : () -> ()
    %119 = vector.shape_cast %118 : vector<2x8x8xf32> to vector<16x8xf32>
    %120 = vector.extract_strided_slice %20 {offsets = [3, 0, 0], sizes = [1, 8, 32], strides = [1, 1, 1]} : vector<4x8x32xf32> to vector<1x8x32xf32>
    %121 = vector.shape_cast %120 : vector<1x8x32xf32> to vector<8x32xf32>
    %cst_61 = arith.constant dense<0.000000e+00> : vector<16x32xf32>
    %122 = tpu.matmul %119, %121, %cst_61 {dimension_numbers = #tpu.dot_dimension_numbers<[1], [0], [0], [1], [0, 0, 1, 1], [], []>} : vector<16x8xf32>, vector<8x32xf32>, vector<16x32xf32> -> vector<16x32xf32>
    %123 = arith.addf %101, %122 : vector<16x32xf32>
    %124 = vector.broadcast %22 : vector<1x32xf32> to vector<16x32xf32>
    %125 = arith.addf %123, %124 : vector<16x32xf32>
    %126 = arith.addf %125, %9 : vector<16x32xf32>
    %127 = vector.extract_strided_slice %32 {offsets = [0, 0], sizes = [1, 32], strides = [1, 1]} : vector<4x32xf32> to vector<1x32xf32>
    %128 = vector.extract_strided_slice %32 {offsets = [1, 0], sizes = [1, 32], strides = [1, 1]} : vector<4x32xf32> to vector<1x32xf32>
    %cst_62 = arith.constant dense<0.000000e+00> : vector<16xf32>
    %129 = vector.multi_reduction <add>, %126, %cst_62 [1] : vector<16x32xf32> to vector<16xf32>
    %130 = vector.shape_cast %129 : vector<16xf32> to vector<16x1xf32>
    %cst_63 = arith.constant 3.200000e+01 : f32
    %131 = vector.broadcast %cst_63 : f32 to vector<16x1xf32>
    %132 = arith.divf %130, %131 : vector<16x1xf32>
    %133 = vector.broadcast %132 : vector<16x1xf32> to vector<16x32xf32>
    %134 = arith.subf %126, %133 : vector<16x32xf32>
    %135 = arith.mulf %134, %134 : vector<16x32xf32>
    %cst_64 = arith.constant dense<0.000000e+00> : vector<16xf32>
    %136 = vector.multi_reduction <add>, %135, %cst_64 [1] : vector<16x32xf32> to vector<16xf32>
    %137 = vector.shape_cast %136 : vector<16xf32> to vector<16x1xf32>
    %cst_65 = arith.constant 3.200000e+01 : f32
    %138 = vector.broadcast %cst_65 : f32 to vector<16x1xf32>
    %139 = arith.divf %137, %138 : vector<16x1xf32>
    %cst_66 = arith.constant 1.000000e-10 : f32
    %140 = vector.broadcast %cst_66 : f32 to vector<16x1xf32>
    %141 = arith.maximumf %139, %140 : vector<16x1xf32>
    %142 = vector.broadcast %132 : vector<16x1xf32> to vector<16x32xf32>
    %143 = arith.subf %126, %142 : vector<16x32xf32>
    %144 = vector.broadcast %127 : vector<1x32xf32> to vector<16x32xf32>
    %145 = arith.mulf %144, %143 : vector<16x32xf32>
    %cst_67 = arith.constant 1.000000e-10 : f32
    %146 = vector.broadcast %cst_67 : f32 to vector<16x1xf32>
    %147 = arith.addf %141, %146 : vector<16x1xf32>
    %148 = math.rsqrt %147 : vector<16x1xf32>
    %149 = vector.broadcast %148 : vector<16x1xf32> to vector<16x32xf32>
    %150 = arith.mulf %145, %149 : vector<16x32xf32>
    %151 = vector.broadcast %128 : vector<1x32xf32> to vector<16x32xf32>
    %152 = arith.addf %150, %151 : vector<16x32xf32>
    %cst_68 = arith.constant dense<0.000000e+00> : vector<16x64xf32>
    %153 = tpu.matmul %152, %24, %cst_68 {dimension_numbers = #tpu.dot_dimension_numbers<[1], [0], [0], [1], [0, 0, 1, 1], [], []>} : vector<16x32xf32>, vector<32x64xf32>, vector<16x64xf32> -> vector<16x64xf32>
    %154 = vector.broadcast %26 : vector<1x64xf32> to vector<16x64xf32>
    %155 = arith.addf %153, %154 : vector<16x64xf32>
    %cst_69 = arith.constant 0.000000e+00 : f32
    %156 = vector.broadcast %cst_69 : f32 to vector<16x64xf32>
    %157 = arith.maximumf %155, %156 : vector<16x64xf32>
    %cst_70 = arith.constant dense<0.000000e+00> : vector<16x32xf32>
    %158 = tpu.matmul %157, %28, %cst_70 {dimension_numbers = #tpu.dot_dimension_numbers<[1], [0], [0], [1], [0, 0, 1, 1], [], []>} : vector<16x64xf32>, vector<64x32xf32>, vector<16x32xf32> -> vector<16x32xf32>
    %159 = vector.broadcast %30 : vector<1x32xf32> to vector<16x32xf32>
    %160 = arith.addf %158, %159 : vector<16x32xf32>
    %161 = arith.addf %160, %152 : vector<16x32xf32>
    %162 = vector.extract_strided_slice %32 {offsets = [2, 0], sizes = [1, 32], strides = [1, 1]} : vector<4x32xf32> to vector<1x32xf32>
    %163 = vector.extract_strided_slice %32 {offsets = [3, 0], sizes = [1, 32], strides = [1, 1]} : vector<4x32xf32> to vector<1x32xf32>
    %cst_71 = arith.constant dense<0.000000e+00> : vector<16xf32>
    %164 = vector.multi_reduction <add>, %161, %cst_71 [1] : vector<16x32xf32> to vector<16xf32>
    %165 = vector.shape_cast %164 : vector<16xf32> to vector<16x1xf32>
    %cst_72 = arith.constant 3.200000e+01 : f32
    %166 = vector.broadcast %cst_72 : f32 to vector<16x1xf32>
    %167 = arith.divf %165, %166 : vector<16x1xf32>
    %168 = vector.broadcast %167 : vector<16x1xf32> to vector<16x32xf32>
    %169 = arith.subf %161, %168 : vector<16x32xf32>
    %170 = arith.mulf %169, %169 : vector<16x32xf32>
    %cst_73 = arith.constant dense<0.000000e+00> : vector<16xf32>
    %171 = vector.multi_reduction <add>, %170, %cst_73 [1] : vector<16x32xf32> to vector<16xf32>
    %172 = vector.shape_cast %171 : vector<16xf32> to vector<16x1xf32>
    %cst_74 = arith.constant 3.200000e+01 : f32
    %173 = vector.broadcast %cst_74 : f32 to vector<16x1xf32>
    %174 = arith.divf %172, %173 : vector<16x1xf32>
    %cst_75 = arith.constant 1.000000e-10 : f32
    %175 = vector.broadcast %cst_75 : f32 to vector<16x1xf32>
    %176 = arith.maximumf %174, %175 : vector<16x1xf32>
    %177 = vector.broadcast %167 : vector<16x1xf32> to vector<16x32xf32>
    %178 = arith.subf %161, %177 : vector<16x32xf32>
    %179 = vector.broadcast %162 : vector<1x32xf32> to vector<16x32xf32>
    %180 = arith.mulf %179, %178 : vector<16x32xf32>
    %cst_76 = arith.constant 1.000000e-10 : f32
    %181 = vector.broadcast %cst_76 : f32 to vector<16x1xf32>
    %182 = arith.addf %176, %181 : vector<16x1xf32>
    %183 = math.rsqrt %182 : vector<16x1xf32>
    %184 = vector.broadcast %183 : vector<16x1xf32> to vector<16x32xf32>
    %185 = arith.mulf %180, %184 : vector<16x32xf32>
    %186 = vector.broadcast %163 : vector<1x32xf32> to vector<16x32xf32>
    %187 = arith.addf %185, %186 : vector<16x32xf32>
    %c1 = arith.constant 1 : index
    %c0_77 = arith.constant 0 : index
    %c0_78 = arith.constant 0 : index
    %188 = vector.load %arg4[%c1, %c0_77, %c0_78] : memref<2x32x96xf32, #tpu.memory_space<vmem>>, vector<1x32x96xf32>
    %189 = vector.shape_cast %188 : vector<1x32x96xf32> to vector<32x96xf32>
    %c1_79 = arith.constant 1 : index
    %c0_80 = arith.constant 0 : index
    %c0_81 = arith.constant 0 : index
    %190 = vector.load %arg5[%c1_79, %c0_80, %c0_81] : memref<2x1x96xf32, #tpu.memory_space<vmem>>, vector<1x1x96xf32>
    %191 = vector.shape_cast %190 : vector<1x1x96xf32> to vector<1x96xf32>
    %c1_82 = arith.constant 1 : index
    %c0_83 = arith.constant 0 : index
    %c0_84 = arith.constant 0 : index
    %c0_85 = arith.constant 0 : index
    %192 = vector.load %arg6[%c1_82, %c0_83, %c0_84, %c0_85] : memref<2x4x8x32xf32, #tpu.memory_space<vmem>>, vector<1x4x8x32xf32>
    %193 = vector.shape_cast %192 : vector<1x4x8x32xf32> to vector<4x8x32xf32>
    %c1_86 = arith.constant 1 : index
    %c0_87 = arith.constant 0 : index
    %c0_88 = arith.constant 0 : index
    %194 = vector.load %arg7[%c1_86, %c0_87, %c0_88] : memref<2x1x32xf32, #tpu.memory_space<vmem>>, vector<1x1x32xf32>
    %195 = vector.shape_cast %194 : vector<1x1x32xf32> to vector<1x32xf32>
    %c1_89 = arith.constant 1 : index
    %c0_90 = arith.constant 0 : index
    %c0_91 = arith.constant 0 : index
    %196 = vector.load %arg8[%c1_89, %c0_90, %c0_91] : memref<2x32x64xf32, #tpu.memory_space<vmem>>, vector<1x32x64xf32>
    %197 = vector.shape_cast %196 : vector<1x32x64xf32> to vector<32x64xf32>
    %c1_92 = arith.constant 1 : index
    %c0_93 = arith.constant 0 : index
    %c0_94 = arith.constant 0 : index
    %198 = vector.load %arg9[%c1_92, %c0_93, %c0_94] : memref<2x1x64xf32, #tpu.memory_space<vmem>>, vector<1x1x64xf32>
    %199 = vector.shape_cast %198 : vector<1x1x64xf32> to vector<1x64xf32>
    %c1_95 = arith.constant 1 : index
    %c0_96 = arith.constant 0 : index
    %c0_97 = arith.constant 0 : index
    %200 = vector.load %arg10[%c1_95, %c0_96, %c0_97] : memref<2x64x32xf32, #tpu.memory_space<vmem>>, vector<1x64x32xf32>
    %201 = vector.shape_cast %200 : vector<1x64x32xf32> to vector<64x32xf32>
    %c1_98 = arith.constant 1 : index
    %c0_99 = arith.constant 0 : index
    %c0_100 = arith.constant 0 : index
    %202 = vector.load %arg11[%c1_98, %c0_99, %c0_100] : memref<2x1x32xf32, #tpu.memory_space<vmem>>, vector<1x1x32xf32>
    %203 = vector.shape_cast %202 : vector<1x1x32xf32> to vector<1x32xf32>
    %c1_101 = arith.constant 1 : index
    %c0_102 = arith.constant 0 : index
    %c0_103 = arith.constant 0 : index
    %204 = vector.load %arg12[%c1_101, %c0_102, %c0_103] : memref<2x4x32xf32, #tpu.memory_space<vmem>>, vector<1x4x32xf32>
    %205 = vector.shape_cast %204 : vector<1x4x32xf32> to vector<4x32xf32>
    %cst_104 = arith.constant dense<0.000000e+00> : vector<16x96xf32>
    %206 = tpu.matmul %187, %189, %cst_104 {dimension_numbers = #tpu.dot_dimension_numbers<[1], [0], [0], [1], [0, 0, 1, 1], [], []>} : vector<16x32xf32>, vector<32x96xf32>, vector<16x96xf32> -> vector<16x96xf32>
    %207 = vector.broadcast %191 : vector<1x96xf32> to vector<16x96xf32>
    %208 = arith.addf %206, %207 : vector<16x96xf32>
    %209 = vector.shape_cast %208 : vector<16x96xf32> to vector<2x8x96xf32>
    %210 = vector.extract_strided_slice %209 {offsets = [0, 0, 0], sizes = [2, 8, 8], strides = [1, 1, 1]} : vector<2x8x96xf32> to vector<2x8x8xf32>
    %211 = vector.extract_strided_slice %209 {offsets = [0, 0, 32], sizes = [2, 8, 8], strides = [1, 1, 1]} : vector<2x8x96xf32> to vector<2x8x8xf32>
    %212 = vector.extract_strided_slice %209 {offsets = [0, 0, 64], sizes = [2, 8, 8], strides = [1, 1, 1]} : vector<2x8x96xf32> to vector<2x8x8xf32>
    "tpu.trace_start"() <{level = 10 : i32, message = "bqd,bkd->bqk"}> : () -> ()
    %cst_105 = arith.constant dense<0.000000e+00> : vector<2x8x8xf32>
    %213 = tpu.matmul %210, %211, %cst_105 {dimension_numbers = #tpu.dot_dimension_numbers<[2], [2], [1], [1], [0, 0, 0, 1, 1, 1], [0], [0]>} : vector<2x8x8xf32>, vector<2x8x8xf32>, vector<2x8x8xf32> -> vector<2x8x8xf32>
    %cst_106 = arith.constant -1.000000e+04 : f32
    "tpu.trace_stop"() : () -> ()
    %214 = vector.broadcast %cst_106 : f32 to vector<2x8x8xf32>
    %215 = arith.select %14, %214, %213 : vector<2x8x8xi1>, vector<2x8x8xf32>
    %cst_107 = arith.constant dense<0xFF800000> : vector<2x8xf32>
    %216 = vector.multi_reduction <maximumf>, %215, %cst_107 [2] : vector<2x8x8xf32> to vector<2x8xf32>
    %217 = vector.shape_cast %216 : vector<2x8xf32> to vector<2x8x1xf32>
    %218 = vector.broadcast %217 : vector<2x8x1xf32> to vector<2x8x8xf32>
    %219 = arith.subf %215, %218 : vector<2x8x8xf32>
    %220 = math.exp %219 : vector<2x8x8xf32>
    %cst_108 = arith.constant dense<0.000000e+00> : vector<2x8xf32>
    %221 = vector.multi_reduction <add>, %220, %cst_108 [2] : vector<2x8x8xf32> to vector<2x8xf32>
    %222 = vector.shape_cast %221 : vector<2x8xf32> to vector<2x8x1xf32>
    %223 = tpu.reciprocal %222 : vector<2x8x1xf32> -> vector<2x8x1xf32>
    %224 = vector.broadcast %223 : vector<2x8x1xf32> to vector<2x8x8xf32>
    %225 = arith.mulf %220, %224 : vector<2x8x8xf32>
    "tpu.trace_start"() <{level = 10 : i32, message = "bqk,bkd->bqd"}> : () -> ()
    %cst_109 = arith.constant dense<0.000000e+00> : vector<2x8x8xf32>
    %226 = tpu.matmul %225, %212, %cst_109 {dimension_numbers = #tpu.dot_dimension_numbers<[2], [1], [1], [2], [0, 0, 0, 1, 1, 2], [0], [0]>} : vector<2x8x8xf32>, vector<2x8x8xf32>, vector<2x8x8xf32> -> vector<2x8x8xf32>
    "tpu.trace_stop"() : () -> ()
    %227 = vector.shape_cast %226 : vector<2x8x8xf32> to vector<16x8xf32>
    %228 = vector.extract_strided_slice %193 {offsets = [0, 0, 0], sizes = [1, 8, 32], strides = [1, 1, 1]} : vector<4x8x32xf32> to vector<1x8x32xf32>
    %229 = vector.shape_cast %228 : vector<1x8x32xf32> to vector<8x32xf32>
    %cst_110 = arith.constant dense<0.000000e+00> : vector<16x32xf32>
    %230 = tpu.matmul %227, %229, %cst_110 {dimension_numbers = #tpu.dot_dimension_numbers<[1], [0], [0], [1], [0, 0, 1, 1], [], []>} : vector<16x8xf32>, vector<8x32xf32>, vector<16x32xf32> -> vector<16x32xf32>
    %231 = vector.extract_strided_slice %209 {offsets = [0, 0, 8], sizes = [2, 8, 8], strides = [1, 1, 1]} : vector<2x8x96xf32> to vector<2x8x8xf32>
    %232 = vector.extract_strided_slice %209 {offsets = [0, 0, 40], sizes = [2, 8, 8], strides = [1, 1, 1]} : vector<2x8x96xf32> to vector<2x8x8xf32>
    %233 = vector.extract_strided_slice %209 {offsets = [0, 0, 72], sizes = [2, 8, 8], strides = [1, 1, 1]} : vector<2x8x96xf32> to vector<2x8x8xf32>
    "tpu.trace_start"() <{level = 10 : i32, message = "bqd,bkd->bqk"}> : () -> ()
    %cst_111 = arith.constant dense<0.000000e+00> : vector<2x8x8xf32>
    %234 = tpu.matmul %231, %232, %cst_111 {dimension_numbers = #tpu.dot_dimension_numbers<[2], [2], [1], [1], [0, 0, 0, 1, 1, 1], [0], [0]>} : vector<2x8x8xf32>, vector<2x8x8xf32>, vector<2x8x8xf32> -> vector<2x8x8xf32>
    %cst_112 = arith.constant -1.000000e+04 : f32
    "tpu.trace_stop"() : () -> ()
    %235 = vector.broadcast %cst_112 : f32 to vector<2x8x8xf32>
    %236 = arith.select %14, %235, %234 : vector<2x8x8xi1>, vector<2x8x8xf32>
    %cst_113 = arith.constant dense<0xFF800000> : vector<2x8xf32>
    %237 = vector.multi_reduction <maximumf>, %236, %cst_113 [2] : vector<2x8x8xf32> to vector<2x8xf32>
    %238 = vector.shape_cast %237 : vector<2x8xf32> to vector<2x8x1xf32>
    %239 = vector.broadcast %238 : vector<2x8x1xf32> to vector<2x8x8xf32>
    %240 = arith.subf %236, %239 : vector<2x8x8xf32>
    %241 = math.exp %240 : vector<2x8x8xf32>
    %cst_114 = arith.constant dense<0.000000e+00> : vector<2x8xf32>
    %242 = vector.multi_reduction <add>, %241, %cst_114 [2] : vector<2x8x8xf32> to vector<2x8xf32>
    %243 = vector.shape_cast %242 : vector<2x8xf32> to vector<2x8x1xf32>
    %244 = tpu.reciprocal %243 : vector<2x8x1xf32> -> vector<2x8x1xf32>
    %245 = vector.broadcast %244 : vector<2x8x1xf32> to vector<2x8x8xf32>
    %246 = arith.mulf %241, %245 : vector<2x8x8xf32>
    "tpu.trace_start"() <{level = 10 : i32, message = "bqk,bkd->bqd"}> : () -> ()
    %cst_115 = arith.constant dense<0.000000e+00> : vector<2x8x8xf32>
    %247 = tpu.matmul %246, %233, %cst_115 {dimension_numbers = #tpu.dot_dimension_numbers<[2], [1], [1], [2], [0, 0, 0, 1, 1, 2], [0], [0]>} : vector<2x8x8xf32>, vector<2x8x8xf32>, vector<2x8x8xf32> -> vector<2x8x8xf32>
    "tpu.trace_stop"() : () -> ()
    %248 = vector.shape_cast %247 : vector<2x8x8xf32> to vector<16x8xf32>
    %249 = vector.extract_strided_slice %193 {offsets = [1, 0, 0], sizes = [1, 8, 32], strides = [1, 1, 1]} : vector<4x8x32xf32> to vector<1x8x32xf32>
    %250 = vector.shape_cast %249 : vector<1x8x32xf32> to vector<8x32xf32>
    %cst_116 = arith.constant dense<0.000000e+00> : vector<16x32xf32>
    %251 = tpu.matmul %248, %250, %cst_116 {dimension_numbers = #tpu.dot_dimension_numbers<[1], [0], [0], [1], [0, 0, 1, 1], [], []>} : vector<16x8xf32>, vector<8x32xf32>, vector<16x32xf32> -> vector<16x32xf32>
    %252 = arith.addf %230, %251 : vector<16x32xf32>
    %253 = vector.extract_strided_slice %209 {offsets = [0, 0, 16], sizes = [2, 8, 8], strides = [1, 1, 1]} : vector<2x8x96xf32> to vector<2x8x8xf32>
    %254 = vector.extract_strided_slice %209 {offsets = [0, 0, 48], sizes = [2, 8, 8], strides = [1, 1, 1]} : vector<2x8x96xf32> to vector<2x8x8xf32>
    %255 = vector.extract_strided_slice %209 {offsets = [0, 0, 80], sizes = [2, 8, 8], strides = [1, 1, 1]} : vector<2x8x96xf32> to vector<2x8x8xf32>
    "tpu.trace_start"() <{level = 10 : i32, message = "bqd,bkd->bqk"}> : () -> ()
    %cst_117 = arith.constant dense<0.000000e+00> : vector<2x8x8xf32>
    %256 = tpu.matmul %253, %254, %cst_117 {dimension_numbers = #tpu.dot_dimension_numbers<[2], [2], [1], [1], [0, 0, 0, 1, 1, 1], [0], [0]>} : vector<2x8x8xf32>, vector<2x8x8xf32>, vector<2x8x8xf32> -> vector<2x8x8xf32>
    %cst_118 = arith.constant -1.000000e+04 : f32
    "tpu.trace_stop"() : () -> ()
    %257 = vector.broadcast %cst_118 : f32 to vector<2x8x8xf32>
    %258 = arith.select %14, %257, %256 : vector<2x8x8xi1>, vector<2x8x8xf32>
    %cst_119 = arith.constant dense<0xFF800000> : vector<2x8xf32>
    %259 = vector.multi_reduction <maximumf>, %258, %cst_119 [2] : vector<2x8x8xf32> to vector<2x8xf32>
    %260 = vector.shape_cast %259 : vector<2x8xf32> to vector<2x8x1xf32>
    %261 = vector.broadcast %260 : vector<2x8x1xf32> to vector<2x8x8xf32>
    %262 = arith.subf %258, %261 : vector<2x8x8xf32>
    %263 = math.exp %262 : vector<2x8x8xf32>
    %cst_120 = arith.constant dense<0.000000e+00> : vector<2x8xf32>
    %264 = vector.multi_reduction <add>, %263, %cst_120 [2] : vector<2x8x8xf32> to vector<2x8xf32>
    %265 = vector.shape_cast %264 : vector<2x8xf32> to vector<2x8x1xf32>
    %266 = tpu.reciprocal %265 : vector<2x8x1xf32> -> vector<2x8x1xf32>
    %267 = vector.broadcast %266 : vector<2x8x1xf32> to vector<2x8x8xf32>
    %268 = arith.mulf %263, %267 : vector<2x8x8xf32>
    "tpu.trace_start"() <{level = 10 : i32, message = "bqk,bkd->bqd"}> : () -> ()
    %cst_121 = arith.constant dense<0.000000e+00> : vector<2x8x8xf32>
    %269 = tpu.matmul %268, %255, %cst_121 {dimension_numbers = #tpu.dot_dimension_numbers<[2], [1], [1], [2], [0, 0, 0, 1, 1, 2], [0], [0]>} : vector<2x8x8xf32>, vector<2x8x8xf32>, vector<2x8x8xf32> -> vector<2x8x8xf32>
    "tpu.trace_stop"() : () -> ()
    %270 = vector.shape_cast %269 : vector<2x8x8xf32> to vector<16x8xf32>
    %271 = vector.extract_strided_slice %193 {offsets = [2, 0, 0], sizes = [1, 8, 32], strides = [1, 1, 1]} : vector<4x8x32xf32> to vector<1x8x32xf32>
    %272 = vector.shape_cast %271 : vector<1x8x32xf32> to vector<8x32xf32>
    %cst_122 = arith.constant dense<0.000000e+00> : vector<16x32xf32>
    %273 = tpu.matmul %270, %272, %cst_122 {dimension_numbers = #tpu.dot_dimension_numbers<[1], [0], [0], [1], [0, 0, 1, 1], [], []>} : vector<16x8xf32>, vector<8x32xf32>, vector<16x32xf32> -> vector<16x32xf32>
    %274 = arith.addf %252, %273 : vector<16x32xf32>
    %275 = vector.extract_strided_slice %209 {offsets = [0, 0, 24], sizes = [2, 8, 8], strides = [1, 1, 1]} : vector<2x8x96xf32> to vector<2x8x8xf32>
    %276 = vector.extract_strided_slice %209 {offsets = [0, 0, 56], sizes = [2, 8, 8], strides = [1, 1, 1]} : vector<2x8x96xf32> to vector<2x8x8xf32>
    %277 = vector.extract_strided_slice %209 {offsets = [0, 0, 88], sizes = [2, 8, 8], strides = [1, 1, 1]} : vector<2x8x96xf32> to vector<2x8x8xf32>
    "tpu.trace_start"() <{level = 10 : i32, message = "bqd,bkd->bqk"}> : () -> ()
    %cst_123 = arith.constant dense<0.000000e+00> : vector<2x8x8xf32>
    %278 = tpu.matmul %275, %276, %cst_123 {dimension_numbers = #tpu.dot_dimension_numbers<[2], [2], [1], [1], [0, 0, 0, 1, 1, 1], [0], [0]>} : vector<2x8x8xf32>, vector<2x8x8xf32>, vector<2x8x8xf32> -> vector<2x8x8xf32>
    %cst_124 = arith.constant -1.000000e+04 : f32
    "tpu.trace_stop"() : () -> ()
    %279 = vector.broadcast %cst_124 : f32 to vector<2x8x8xf32>
    %280 = arith.select %14, %279, %278 : vector<2x8x8xi1>, vector<2x8x8xf32>
    %cst_125 = arith.constant dense<0xFF800000> : vector<2x8xf32>
    %281 = vector.multi_reduction <maximumf>, %280, %cst_125 [2] : vector<2x8x8xf32> to vector<2x8xf32>
    %282 = vector.shape_cast %281 : vector<2x8xf32> to vector<2x8x1xf32>
    %283 = vector.broadcast %282 : vector<2x8x1xf32> to vector<2x8x8xf32>
    %284 = arith.subf %280, %283 : vector<2x8x8xf32>
    %285 = math.exp %284 : vector<2x8x8xf32>
    %cst_126 = arith.constant dense<0.000000e+00> : vector<2x8xf32>
    %286 = vector.multi_reduction <add>, %285, %cst_126 [2] : vector<2x8x8xf32> to vector<2x8xf32>
    %287 = vector.shape_cast %286 : vector<2x8xf32> to vector<2x8x1xf32>
    %288 = tpu.reciprocal %287 : vector<2x8x1xf32> -> vector<2x8x1xf32>
    %289 = vector.broadcast %288 : vector<2x8x1xf32> to vector<2x8x8xf32>
    %290 = arith.mulf %285, %289 : vector<2x8x8xf32>
    "tpu.trace_start"() <{level = 10 : i32, message = "bqk,bkd->bqd"}> : () -> ()
    %cst_127 = arith.constant dense<0.000000e+00> : vector<2x8x8xf32>
    %291 = tpu.matmul %290, %277, %cst_127 {dimension_numbers = #tpu.dot_dimension_numbers<[2], [1], [1], [2], [0, 0, 0, 1, 1, 2], [0], [0]>} : vector<2x8x8xf32>, vector<2x8x8xf32>, vector<2x8x8xf32> -> vector<2x8x8xf32>
    "tpu.trace_stop"() : () -> ()
    %292 = vector.shape_cast %291 : vector<2x8x8xf32> to vector<16x8xf32>
    %293 = vector.extract_strided_slice %193 {offsets = [3, 0, 0], sizes = [1, 8, 32], strides = [1, 1, 1]} : vector<4x8x32xf32> to vector<1x8x32xf32>
    %294 = vector.shape_cast %293 : vector<1x8x32xf32> to vector<8x32xf32>
    %cst_128 = arith.constant dense<0.000000e+00> : vector<16x32xf32>
    %295 = tpu.matmul %292, %294, %cst_128 {dimension_numbers = #tpu.dot_dimension_numbers<[1], [0], [0], [1], [0, 0, 1, 1], [], []>} : vector<16x8xf32>, vector<8x32xf32>, vector<16x32xf32> -> vector<16x32xf32>
    %296 = arith.addf %274, %295 : vector<16x32xf32>
    %297 = vector.broadcast %195 : vector<1x32xf32> to vector<16x32xf32>
    %298 = arith.addf %296, %297 : vector<16x32xf32>
    %299 = arith.addf %298, %187 : vector<16x32xf32>
    %300 = vector.extract_strided_slice %205 {offsets = [0, 0], sizes = [1, 32], strides = [1, 1]} : vector<4x32xf32> to vector<1x32xf32>
    %301 = vector.extract_strided_slice %205 {offsets = [1, 0], sizes = [1, 32], strides = [1, 1]} : vector<4x32xf32> to vector<1x32xf32>
    %cst_129 = arith.constant dense<0.000000e+00> : vector<16xf32>
    %302 = vector.multi_reduction <add>, %299, %cst_129 [1] : vector<16x32xf32> to vector<16xf32>
    %303 = vector.shape_cast %302 : vector<16xf32> to vector<16x1xf32>
    %cst_130 = arith.constant 3.200000e+01 : f32
    %304 = vector.broadcast %cst_130 : f32 to vector<16x1xf32>
    %305 = arith.divf %303, %304 : vector<16x1xf32>
    %306 = vector.broadcast %305 : vector<16x1xf32> to vector<16x32xf32>
    %307 = arith.subf %299, %306 : vector<16x32xf32>
    %308 = arith.mulf %307, %307 : vector<16x32xf32>
    %cst_131 = arith.constant dense<0.000000e+00> : vector<16xf32>
    %309 = vector.multi_reduction <add>, %308, %cst_131 [1] : vector<16x32xf32> to vector<16xf32>
    %310 = vector.shape_cast %309 : vector<16xf32> to vector<16x1xf32>
    %cst_132 = arith.constant 3.200000e+01 : f32
    %311 = vector.broadcast %cst_132 : f32 to vector<16x1xf32>
    %312 = arith.divf %310, %311 : vector<16x1xf32>
    %cst_133 = arith.constant 1.000000e-10 : f32
    %313 = vector.broadcast %cst_133 : f32 to vector<16x1xf32>
    %314 = arith.maximumf %312, %313 : vector<16x1xf32>
    %315 = vector.broadcast %305 : vector<16x1xf32> to vector<16x32xf32>
    %316 = arith.subf %299, %315 : vector<16x32xf32>
    %317 = vector.broadcast %300 : vector<1x32xf32> to vector<16x32xf32>
    %318 = arith.mulf %317, %316 : vector<16x32xf32>
    %cst_134 = arith.constant 1.000000e-10 : f32
    %319 = vector.broadcast %cst_134 : f32 to vector<16x1xf32>
    %320 = arith.addf %314, %319 : vector<16x1xf32>
    %321 = math.rsqrt %320 : vector<16x1xf32>
    %322 = vector.broadcast %321 : vector<16x1xf32> to vector<16x32xf32>
    %323 = arith.mulf %318, %322 : vector<16x32xf32>
    %324 = vector.broadcast %301 : vector<1x32xf32> to vector<16x32xf32>
    %325 = arith.addf %323, %324 : vector<16x32xf32>
    %cst_135 = arith.constant dense<0.000000e+00> : vector<16x64xf32>
    %326 = tpu.matmul %325, %197, %cst_135 {dimension_numbers = #tpu.dot_dimension_numbers<[1], [0], [0], [1], [0, 0, 1, 1], [], []>} : vector<16x32xf32>, vector<32x64xf32>, vector<16x64xf32> -> vector<16x64xf32>
    %327 = vector.broadcast %199 : vector<1x64xf32> to vector<16x64xf32>
    %328 = arith.addf %326, %327 : vector<16x64xf32>
    %cst_136 = arith.constant 0.000000e+00 : f32
    %329 = vector.broadcast %cst_136 : f32 to vector<16x64xf32>
    %330 = arith.maximumf %328, %329 : vector<16x64xf32>
    %cst_137 = arith.constant dense<0.000000e+00> : vector<16x32xf32>
    %331 = tpu.matmul %330, %201, %cst_137 {dimension_numbers = #tpu.dot_dimension_numbers<[1], [0], [0], [1], [0, 0, 1, 1], [], []>} : vector<16x64xf32>, vector<64x32xf32>, vector<16x32xf32> -> vector<16x32xf32>
    %332 = vector.broadcast %203 : vector<1x32xf32> to vector<16x32xf32>
    %333 = arith.addf %331, %332 : vector<16x32xf32>
    %334 = arith.addf %333, %325 : vector<16x32xf32>
    %335 = vector.extract_strided_slice %205 {offsets = [2, 0], sizes = [1, 32], strides = [1, 1]} : vector<4x32xf32> to vector<1x32xf32>
    %336 = vector.extract_strided_slice %205 {offsets = [3, 0], sizes = [1, 32], strides = [1, 1]} : vector<4x32xf32> to vector<1x32xf32>
    %cst_138 = arith.constant dense<0.000000e+00> : vector<16xf32>
    %337 = vector.multi_reduction <add>, %334, %cst_138 [1] : vector<16x32xf32> to vector<16xf32>
    %338 = vector.shape_cast %337 : vector<16xf32> to vector<16x1xf32>
    %cst_139 = arith.constant 3.200000e+01 : f32
    %339 = vector.broadcast %cst_139 : f32 to vector<16x1xf32>
    %340 = arith.divf %338, %339 : vector<16x1xf32>
    %341 = vector.broadcast %340 : vector<16x1xf32> to vector<16x32xf32>
    %342 = arith.subf %334, %341 : vector<16x32xf32>
    %343 = arith.mulf %342, %342 : vector<16x32xf32>
    %cst_140 = arith.constant dense<0.000000e+00> : vector<16xf32>
    %344 = vector.multi_reduction <add>, %343, %cst_140 [1] : vector<16x32xf32> to vector<16xf32>
    %345 = vector.shape_cast %344 : vector<16xf32> to vector<16x1xf32>
    %cst_141 = arith.constant 3.200000e+01 : f32
    %346 = vector.broadcast %cst_141 : f32 to vector<16x1xf32>
    %347 = arith.divf %345, %346 : vector<16x1xf32>
    %cst_142 = arith.constant 1.000000e-10 : f32
    %348 = vector.broadcast %cst_142 : f32 to vector<16x1xf32>
    %349 = arith.maximumf %347, %348 : vector<16x1xf32>
    %350 = vector.broadcast %340 : vector<16x1xf32> to vector<16x32xf32>
    %351 = arith.subf %334, %350 : vector<16x32xf32>
    %352 = vector.broadcast %335 : vector<1x32xf32> to vector<16x32xf32>
    %353 = arith.mulf %352, %351 : vector<16x32xf32>
    %cst_143 = arith.constant 1.000000e-10 : f32
    %354 = vector.broadcast %cst_143 : f32 to vector<16x1xf32>
    %355 = arith.addf %349, %354 : vector<16x1xf32>
    %356 = math.rsqrt %355 : vector<16x1xf32>
    %357 = vector.broadcast %356 : vector<16x1xf32> to vector<16x32xf32>
    %358 = arith.mulf %353, %357 : vector<16x32xf32>
    %359 = vector.broadcast %336 : vector<1x32xf32> to vector<16x32xf32>
    %360 = arith.addf %358, %359 : vector<16x32xf32>
    %c0_144 = arith.constant 0 : index
    %c0_145 = arith.constant 0 : index
    %361 = vector.load %arg13[%c0_144, %c0_145] : memref<16x32xf32, #tpu.memory_space<vmem>>, vector<16x32xf32>
    tpu.vector_store %arg13[%c0_144, %c0_145], %360 {strides = array<i32>} : memref<16x32xf32, #tpu.memory_space<vmem>>, vector<16x32xf32>,
    return
  }
}

</mosaic_0001>

<bundles_post_ra>
// kernel: tpu_custom_call.1
= control target key start
LH: loop header
LB: loop body
LE: loop exit
PB: predicated region body
PF: predicated region fallthrough
CT: control target
= control target key end

     0   :  { %v5037_v1 = vmov 0   ;;  %s5755_s0 = inlined_call_operand.vmem [shape: s32[16,1], index: 0, kind: input, shape index: {}]   ;;  %s5756_s1 = inlined_call_operand.vmem [shape: f32[16,32], index: 1, kind: input, shape index: {}]   ;;  %s5757_s2 = inlined_call_operand.vmem [shape: f32[2,1,8], index: 2, kind: input, shape index: {}]   ;;  %s5758_s3 = inlined_call_operand.vmem [shape: f32[64,32], index: 3, kind: input, shape index: {}]   ;;  %s5759_s4 = inlined_call_operand.vmem [shape: f32[2,32,96], index: 4, kind: input, shape index: {}]   ;;  %s5760_s5 = inlined_call_operand.vmem [shape: f32[2,1,96], index: 5, kind: input, shape index: {}]   ;;  %s5761_s6 = inlined_call_operand.vmem [shape: f32[2,4,8,32], index: 6, kind: input, shape index: {}]   ;;  %s5762_s7 = inlined_call_operand.vmem [shape: f32[2,1,32], index: 7, kind: input, shape index: {}]   ;;  %s5763_s8 = inlined_call_operand.vmem [shape: f32[2,32,64], index: 8, kind: input, shape index: {}]   ;;  %s5764_s9 = inlined_call_operand.vmem [shape: f32[2,1,64], index: 9, kind: input, shape index: {}]   ;;  %s5765_s10 = inlined_call_operand.vmem [shape: f32[2,64,32], index: 10, kind: input, shape index: {}]   ;;  %s5766_s11 = inlined_call_operand.vmem [shape: f32[2,1,32], index: 11, kind: input, shape index: {}]   ;;  %s5767_s12 = inlined_call_operand.vmem [shape: f32[2,4,32], index: 12, kind: input, shape index: {}]   ;;  %s5768_s13 = inlined_call_operand.hbm [shape: f32[16,32], index: 13, kind: output, shape index: {}]  }
   0x1   :  { %v45_v0 = vld [vmem:[%s5755_s0] sm:$0xff]  ;;  %4932 = vset.pattern.permute.xlu0 %v5037_v1  ;;  %v62_v3 = vld [vmem:[%s5758_s3 + $0x8] sm:$0xff]  ;;  %v63_v5 = vld [vmem:[%s5758_s3 + $0x10] sm:$0xff] }
   0x2   :  { %v61_v2 = vld [vmem:[%s5758_s3] sm:$0xff]  ;;  %50 = vperm.xlu0 %4932, %v45_v0   ;;  %v64_v6 = vld [vmem:[%s5758_s3 + $0x18] sm:$0xff]  ;;  %v46_v7 = vld [vmem:[%s5755_s0 + $0x8] sm:$0xff] }
   0x3   :  { %v4823_v4 = vpack.c.bf16 %v62_v3, %v61_v2  ;;  %v4827_v8 = vpack.c.bf16 %v64_v6, %v63_v5  ;;  %v65_v9 = vld [vmem:[%s5758_s3 + $0x20] sm:$0xff]  ;;  %v66_v10 = vld [vmem:[%s5758_s3 + $0x28] sm:$0xff] }
   0x5   :  { %4824 = vmatprep.subr.bf16.mxu0 %v4823_v4 }
   0x6   :  { %18 = vsyncpa [#allocation3], 0  ;;  %4826 = vmatpush3.bf16.msra.mxu0 %v4823_v4  ;;  %53 = vperm.xlu0 %4932, %v46_v7   ;;  %v4831_v11 = vpack.c.bf16 %v66_v10, %v65_v9  ;;  %v67_v12 = vld [vmem:[%s5758_s3 + $0x30] sm:$0xff]  ;;  %v68_v13 = vld [vmem:[%s5758_s3 + $0x38] sm:$0xff]  ;;  %v5038_v18 = vmov 0.0   ;;  %v47_v19 = vlaneseq  ;;  %vm71_vm0 = vcmask 523264  }
   0x7   :  { %4828 = vmatprep.subr.bf16.mxu0 %v4827_v8  ;;  %v169_v14 = vld [vmem:[%s5759_s4] sm:$0xff]  ;;  %v170_v15 = vld [vmem:[%s5759_s4 + $0x8] sm:$0xff]  ;;  %v4835_v17 = vpack.c.bf16 %v68_v13, %v67_v12  ;;  %v171_v25 = vld [vmem:[%s5759_s4 + $0x10] sm:$0xff]  ;;  %vm200_vm3 = vcmask 261120   ;;  %vm5039_vm4 = vmmov 0   ;;  %s5040_s22 = smov 96  }
   0x8   :  { %v4839_v16 = vpack.c.bf16 %v170_v15, %v169_v14  ;;  %v48_v20 = vand.u32 127, %v47_v19  ;;  %v172_v26 = vld [vmem:[%s5759_s4 + $0x18] sm:$0xff]  ;;  %v69_v28 = vld [vmem:[%s5756_s1] sm:$0xff]  ;;  %v70_v29 = vld [vmem:[%s5756_s1 + $0x8] sm:$0xff]  ;;  %vm285_vm5 = vcmask 64512   ;;  %v5217_v42 = vshrl.u32 %v47_v19, 7 }
   0x9   :  { %v4843_v27 = vpack.c.bf16 %v172_v26, %v171_v25  ;;  %v4271_v34 = vld [vmem:[%s5760_s5] ss:$0 sm:$0xff]  ;;  %v154_v43 = vld [vmem:[%s5757_s2 + $0x1] sm:$0x1]  ;;  %s5042_s26 = smov 88   ;;  %s5043_s27 = smov 120  }
   0xa   :  { %4830 = vmatpush3.bf16.msra.mxu0 %v4827_v8  ;;  %4840 = vmatprep.subr.bf16.mxu1 %v4839_v16  ;;  %v153_v41 = vld [vmem:[%s5757_s2] sm:$0x1]  ;;  %v5223_v44 = vsub.s32 0, %v5217_v42  ;;  %vm156_vm7 = vcmp.eq.f32.partialorder %v154_v43, 0.0  ;;  %s5041_s2 = smov 64   ;;  %s5044_s28 = smov 80  }
   0xb   :  { %4832 = vmatprep.subr.bf16.mxu0 %v4831_v11  ;;  %4842 = vmatpush3.bf16.msra.mxu1 %v4839_v16  ;;  %vm155_vm6 = vcmp.eq.f32.partialorder %v153_v41, 0.0  ;;  %v158_v47 = vsel %vm156_vm7, 1, %v5037_v1  ;;  %s5045_s29 = smov 56   ;;  %s5046_s30 = smov 112  }
   0xc   :  { %4844 = vmatprep.subr.bf16.mxu1 %v4843_v27  ;;  %v157_v45 = vsel %vm155_vm6, 1, %v5037_v1  ;;  %v166_v49 = vrot.slane %v158_v47, %v5223_v44  ;;  %s5047_s3 = smov 48   ;;  %s5048_s14 = smov 72  }
   0xd   :  { %v162_v46 = vrot.slane %v157_v45, %v5223_v44  ;;  %s5049_s15 = smov 104   ;;  %s5050_s21 = smov 40  }
   0xe   :  { %4834 = vmatpush3.bf16.msra.mxu0 %v4831_v11  ;;  %vm5236_vm9 = vcmp.eq.s32.totalorder %v166_v49, 1 }
   0xf   :  { %4836 = vmatprep.subr.bf16.mxu0 %v4835_v17  ;;  %4846 = vmatpush3.bf16.msra.mxu1 %v4843_v27  ;;  %vm5228_vm8 = vcmp.eq.s32.totalorder %v162_v46, 1 }
  0x10   :  { %4552 = vmatprep.subr.mxu1 %v5038_v18 }
  0x12   :  { %4838 = vmatpush3.bf16.msra.mxu0 %v4835_v17 }
  0x13   :  { %4582 = vmatprep.subr.mxu0 %v5038_v18 }
  0x81   :  { %v51_v21 = vpop.permute.xlu0 %50 }
  0x82   :  { %vm55_vm1 = vcmp.eq.s32.totalorder %v48_v20, %v51_v21 }
  0x83   :  { %v4267_v22 = vsel %vm55_vm1, 1.0, %v5038_v18 }
  0x84   :  { %4538 = vmatprep.mubr.msk.f32.mxu0 %vm71_vm0, %v4267_v22 }
  0x85   :  { %v54_v23 = vpop.permute.xlu0 %53 }
  0x86   :  { %vm56_vm2 = vcmp.eq.s32.totalorder %v48_v20, %v54_v23 }
  0x87   :  { %v4268_v24 = vsel %vm56_vm2, 1.0, %v5038_v18 }
  0x88   :  { %4539 = vmatmul.mubr.msk.f32.vlgmr.msra.gmra.mrb[0].mxu0 %vm71_vm0, %v4268_v24 }
  0x89   :  { %4584 = vmatprep.mubr.msk.f32.mxu0 %vm5039_vm4, %v5038_v18 }
 0x15b   :  { %v4540_v30 = vpop.f32.mrb[0].mxu0 }
 0x15c   :  { %v144_v31 = vpop.f32.mrb[1].mxu0  ;;  %v5181_v33 = vadd.f32 %v4540_v30, %v70_v29 }
 0x15d   :  { %v5179_v32 = vadd.f32 %v144_v31, %v69_v28 }
 0x15f   :  { %4549 = vmatprep.mubr.msk.f32.mxu1 %vm200_vm3, %v5179_v32 }
 0x160   :  { %4550 = vmatmul.mubr.msk.f32.vlgmr.msra.gmra.mrb[0].mxu1 %vm200_vm3, %v5181_v33 }
 0x161   :  { %4554 = vmatprep.mubr.msk.f32.mxu1 %vm5039_vm4, %v5038_v18 }
 0x233   :  { %v4551_v35 = vpop.f32.mrb[0].mxu1 }
 0x234   :  { %v273_v36 = vpop.f32.mrb[1].mxu1  ;;  %v5198_v38 = vadd.f32 %v4551_v35, %v4271_v34 }
 0x235   :  { %v5194_v37 = vadd.f32 %v4271_v34, %v273_v36 }
 0x237   :  { %283 = vrot.lane.b32.xlu1 %v5194_v37, %s5040_s22 }
 0x23b   :  { %361 = vrot.lane.b32.xlu1 %v5198_v38, %s5040_s22 }
 0x2a9   :  { %v284_v39 = vpop.permute.xlu1 %283 }
 0x2aa   :  { %4553 = vmatpush3.xpose.msk.msra.mxu1 %vm285_vm5, %v284_v39 }
 0x2ab   :  { %4557 = vmatprep.subr.mxu1 %v5038_v18 }
 0x2ad   :  { %4555 = vmatmul.mubr.msk.f32.vlgmr.msra.gmra.mrb[2].mxu1 %vm285_vm5, %v5194_v37  ;;  %v362_v40 = vpop.permute.xlu1 %361 }
 0x2ae   :  { %4558 = vmatpush3.xpose.msk.msra.mxu1 %vm285_vm5, %v362_v40  ;;  %4559 = vmatprep.mubr.msk.f32.mxu1 %vm5039_vm4, %v5038_v18 }
 0x2af   :  { %4562 = vmatprep.subr.mxu1 %v5038_v18 }
 0x2b1   :  { %4560 = vmatmul.mubr.msk.f32.vlgmr.msra.gmra.mrb[4].mxu1 %vm285_vm5, %v5198_v38 }
 0x2b2   :  { %4564 = vmatprep.mubr.msk.f32.mxu1 %vm5039_vm4, %v5038_v18 }
 0x380   :  { %v356_v50 = vpop.f32.mrb[2].mxu1 }
 0x381   :  { %v437_v51 = vsel %vm5228_vm8, -10000.0, %v356_v50  ;;  %v4556_v52 = vpop.f32.mrb[3].mxu1 }
 0x382   :  { %v439_v53 = vsel %vm285_vm5, %v437_v51, -inf }
 0x383   :  { %440 = vmax.xlane.f32.xlu0 %v439_v53 }
 0x384   :  { %v433_v55 = vpop.f32.mrb[4].mxu1 }
 0x385   :  { %v438_v56 = vsel %vm5236_vm9, -10000.0, %v433_v55  ;;  %v4561_v57 = vpop.f32.mrb[5].mxu1 }
 0x386   :  { %v442_v58 = vsel %vm285_vm5, %v438_v56, -inf }
 0x387   :  { %443 = vmax.xlane.f32.xlu1 %v442_v58 }
 0x398   :  { %461 = vrot.lane.b32.xlu1 %v5194_v37, %s5041_s2 }
 0x39c   :  { %615 = vrot.lane.b32.xlu1 %v5194_v37, %s5042_s26 }
 0x3a0   :  { %613 = vrot.lane.b32.xlu1 %v5194_v37, %s5043_s27 }
 0x3a4   :  { %691 = vrot.lane.b32.xlu1 %v5198_v38, %s5043_s27 }
 0x3a8   :  { %1109 = vrot.lane.b32.xlu1 %v5194_v37, %s5044_s28 }
 0x410   :  { %v441_v59 = vpop.xlane.xlu0 %440 }
 0x411   :  { %v445_v60 = vsub.f32 %v437_v51, %v441_v59 }
 0x413   :  { %v447_v61 = vmul.f32 1.442695, %v445_v60 }
 0x414   :  { %v444_v62 = vpop.xlane.xlu1 %443 }
 0x415   :  { %4933 = vpow2.f32 %v447_v61  ;;  %v446_v63 = vsub.f32 %v438_v56, %v444_v62 }
 0x417   :  { %v449_v0 = vmul.f32 1.442695, %v446_v63 }
 0x418   :  { %v462_v1 = vpop.permute.xlu1 %461 }
 0x419   :  { %4935 = vpow2.f32 %v449_v0  ;;  %4563 = vmatpush3.msra.mxu1 %v462_v1 }
 0x41a   :  { %4567 = vmatprep.subr.mxu1 %v5038_v18 }
 0x41c   :  { %v616_v12 = vpop.permute.xlu1 %615 }
 0x41f   :  { %v4934_v2 = vpop.eup %4933 }
 0x420   :  { %v451_v3 = vsel %vm285_vm5, %v4934_v2, 0.0  ;;  %v614_v14 = vpop.permute.xlu1 %613 }
 0x421   :  { %452 = vadd.xlane.f32.xlu0 %v451_v3 }
 0x423   :  { %v4936_v4 = vpop.eup %4935 }
 0x424   :  { %v454_v5 = vsel %vm285_vm5, %v4936_v4, 0.0  ;;  %v692_v16 = vpop.permute.xlu1 %691 }
 0x425   :  { %455 = vadd.xlane.f32.xlu0 %v454_v5 }
 0x428   :  { %v1110_v40 = vpop.permute.xlu1 %1109 }
 0x43b   :  { %537 = vrot.lane.b32.xlu0 %v5198_v38, %s5041_s2 }
 0x43f   :  { %693 = vrot.lane.b32.xlu0 %v5198_v38, %s5042_s26 }
 0x4ae   :  { %v453_v6 = vpop.xlane.xlu0 %452 }
 0x4af   :  { %4937 = vrcp.f32 %v453_v6 }
 0x4b2   :  { %v456_v7 = vpop.xlane.xlu0 %455 }
 0x4b3   :  { %4939 = vrcp.f32 %v456_v7  ;;  %v175_v7 = vld [vmem:[%s5761_s6 + $0x8] sm:$0xff] }
 0x4b6   :  { %v538_v10 = vpop.permute.xlu0 %537 }
 0x4b9   :  { %v4938_v8 = vpop.eup %4937 }
 0x4ba   :  { %v459_v9 = vmul.f32 %v4938_v8, %v4934_v2  ;;  %v694_v15 = vpop.permute.xlu0 %693  ;;  %v174_v8 = vld [vmem:[%s5761_s6] sm:$0xff] }
 0x4bc   :  { %4565 = vmatmul.mubr.msk.f32.vlgmr.msra.gmra.mrb[6].mxu1 %vm285_vm5, %v459_v9 }
 0x4bd   :  { %v4940_v11 = vpop.eup %4939  ;;  %4568 = vmatpush3.msra.mxu1 %v538_v10  ;;  %4569 = vmatprep.mubr.msk.f32.mxu1 %vm5039_vm4, %v5038_v18 }
 0x4be   :  { %v460_v13 = vmul.f32 %v4940_v11, %v4936_v4  ;;  %4572 = vmatprep.subr.mxu1 %v5038_v18 }
 0x4c0   :  { %4570 = vmatmul.mubr.msk.f32.vlgmr.msra.gmra.mrb[8].mxu1 %vm285_vm5, %v460_v13 }
 0x4c1   :  { %4574 = vmatprep.mubr.msk.f32.mxu1 %vm5039_vm4, %v5038_v18 }
 0x4c4   :  { %4573 = vmatpush3.xpose.msk.msra.mxu1 %vm285_vm5, %v616_v12 }
 0x4c5   :  { %4577 = vmatprep.subr.mxu1 %v5038_v18 }
 0x4c7   :  { %4575 = vmatmul.mubr.msk.f32.vlgmr.msra.gmra.mrb[10].mxu1 %vm285_vm5, %v614_v14 }
 0x4c8   :  { %4578 = vmatpush3.xpose.msk.msra.mxu1 %vm285_vm5, %v694_v15  ;;  %4579 = vmatprep.mubr.msk.f32.mxu1 %vm5039_vm4, %v5038_v18 }
 0x4c9   :  { %4587 = vmatprep.subr.mxu1 %v5038_v18 }
 0x4cb   :  { %4580 = vmatmul.mubr.msk.f32.vlgmr.msra.gmra.mrb[12].mxu1 %vm285_vm5, %v692_v16 }
 0x4cc   :  { %4589 = vmatprep.mubr.msk.f32.mxu1 %vm5039_vm4, %v5038_v18 }
 0x58f   :  { %v5277_v17 = vpop.f32.mrb[6].mxu1 }
 0x590   :  { %v4566_v19 = vpop.f32.mrb[7].mxu1 }
 0x593   :  { %v5279_v20 = vpop.f32.mrb[8].mxu1 }
 0x594   :  { %v4571_v21 = vpop.f32.mrb[9].mxu1 }
 0x59a   :  { %v687_v22 = vpop.f32.mrb[10].mxu1 }
 0x59b   :  { %v4576_v23 = vpop.f32.mrb[11].mxu1  ;;  %v769_v36 = vsel %vm5228_vm8, -10000.0, %v687_v22 }
 0x59c   :  { %v771_v39 = vsel %vm285_vm5, %v769_v36, -inf }
 0x59e   :  { %v765_v24 = vpop.f32.mrb[12].mxu1 }
 0x59f   :  { %v770_v25 = vsel %vm5236_vm9, -10000.0, %v765_v24  ;;  %v4581_v26 = vpop.f32.mrb[13].mxu1 }
 0x5a0   :  { %v774_v27 = vsel %vm285_vm5, %v770_v25, -inf  ;;  %v176_v26 = vld [vmem:[%s5761_s6 + $0x10] sm:$0xff] }
 0x5a1   :  { %775 = vmax.xlane.f32.xlu0 %v774_v27 }
 0x5b7   :  { %869 = vrot.lane.b32.xlu0 %v5198_v38, %s5045_s29 }
 0x5bb   :  { %1107 = vrot.lane.b32.xlu0 %v5194_v37, %s5046_s30 }
 0x5bf   :  { %1185 = vrot.lane.b32.xlu0 %v5198_v38, %s5046_s30 }
 0x62e   :  { %v776_v28 = vpop.xlane.xlu0 %775 }
 0x62f   :  { %v778_v29 = vsub.f32 %v770_v25, %v776_v28 }
 0x631   :  { %v781_v30 = vmul.f32 1.442695, %v778_v29 }
 0x632   :  { %v870_v31 = vpop.permute.xlu0 %869 }
 0x633   :  { %4941 = vpow2.f32 %v781_v30  ;;  %4588 = vmatpush3.msra.mxu1 %v870_v31 }
 0x634   :  { %4602 = vmatprep.subr.mxu1 %v5038_v18 }
 0x636   :  { %v1108_v46 = vpop.permute.xlu0 %1107 }
 0x63a   :  { %v1186_v49 = vpop.permute.xlu0 %1185 }
 0x63d   :  { %v4942_v34 = vpop.eup %4941 }
 0x63e   :  { %v786_v35 = vsel %vm285_vm5, %v4942_v34, 0.0 }
 0x63f   :  { %787 = vadd.xlane.f32.xlu1 %v786_v35 }
 0x650   :  { %1187 = vrot.lane.b32.xlu1 %v5198_v38, %s5044_s28 }
 0x674   :  { %772 = vmax.xlane.f32.xlu1 %v771_v39 }
 0x6cc   :  { %v788_v41 = vpop.xlane.xlu1 %787 }
 0x6cd   :  { %4943 = vrcp.f32 %v788_v41 }
 0x6d0   :  { %v1188_v47 = vpop.permute.xlu1 %1187 }
 0x6d7   :  { %v4944_v43 = vpop.eup %4943 }
 0x6d8   :  { %v792_v45 = vmul.f32 %v4944_v43, %v4942_v34 }
 0x6da   :  { %4590 = vmatmul.mubr.msk.f32.vlgmr.msra.gmra.mrb[14].mxu1 %vm285_vm5, %v792_v45 }
 0x6db   :  { %4603 = vmatpush3.xpose.msk.msra.mxu1 %vm285_vm5, %v1110_v40  ;;  %4604 = vmatprep.mubr.msk.f32.mxu1 %vm5039_vm4, %v5038_v18 }
 0x6dc   :  { %4607 = vmatprep.subr.mxu1 %v5038_v18 }
 0x6de   :  { %4605 = vmatmul.mubr.msk.f32.vlgmr.msra.gmra.mrb[16].mxu1 %vm285_vm5, %v1108_v46 }
 0x6df   :  { %4608 = vmatpush3.xpose.msk.msra.mxu1 %vm285_vm5, %v1188_v47  ;;  %4609 = vmatprep.mubr.msk.f32.mxu1 %vm5039_vm4, %v5038_v18 }
 0x6e0   :  { %4617 = vmatprep.subr.mxu1 %v5038_v18 }
 0x6e2   :  { %4610 = vmatmul.mubr.msk.f32.vlgmr.msra.gmra.mrb[18].mxu1 %vm285_vm5, %v1186_v49 }
 0x6e3   :  { %4619 = vmatprep.mubr.msk.f32.mxu1 %vm5039_vm4, %v5038_v18 }
 0x701   :  { %v773_v50 = vpop.xlane.xlu1 %772 }
 0x702   :  { %v777_v51 = vsub.f32 %v769_v36, %v773_v50 }
 0x704   :  { %v779_v52 = vmul.f32 1.442695, %v777_v51 }
 0x706   :  { %4945 = vpow2.f32 %v779_v52 }
 0x710   :  { %v4946_v53 = vpop.eup %4945 }
 0x711   :  { %v783_v55 = vsel %vm285_vm5, %v4946_v53, 0.0 }
 0x712   :  { %784 = vadd.xlane.f32.xlu0 %v783_v55 }
 0x728   :  { %793 = vrot.lane.b32.xlu0 %v5194_v37, %s5045_s29 }
 0x72c   :  { %1363 = vrot.lane.b32.xlu0 %v5198_v38, %s5047_s3 }
 0x730   :  { %1524 = vrot.lane.b32.xlu0 %v5194_v37, %s5048_s14 }
 0x734   :  { %1602 = vrot.lane.b32.xlu0 %v5198_v38, %s5048_s14 }
 0x738   :  { %1522 = vrot.lane.b32.xlu0 %v5194_v37, %s5049_s15 }
 0x79f   :  { %v785_v56 = vpop.xlane.xlu0 %784 }
 0x7a0   :  { %4947 = vrcp.f32 %v785_v56 }
 0x7a3   :  { %v794_v57 = vpop.permute.xlu0 %793 }
 0x7a4   :  { %4583 = vmatpush3.msra.mxu0 %v794_v57 }
 0x7a5   :  { %4592 = vmatprep.subr.mxu0 %v175_v7 }
 0x7a7   :  { %v1364_v58 = vpop.permute.xlu0 %1363 }
 0x7a8   :  { %4618 = vmatpush3.msra.mxu1 %v1364_v58 }
 0x7a9   :  { %4627 = vmatprep.subr.mxu1 %v5038_v18 }
 0x7aa   :  { %v4948_v59 = vpop.eup %4947 }
 0x7ab   :  { %v791_v60 = vmul.f32 %v4948_v59, %v4946_v53  ;;  %v1525_v28 = vpop.permute.xlu0 %1524 }
 0x7ad   :  { %4585 = vmatmul.mubr.msk.f32.vlgmr.msra.gmra.mrb[2].mxu0 %vm285_vm5, %v791_v60  ;;  %v941_v61 = vpop.f32.mrb[14].mxu1 }
 0x7ae   :  { %v4591_v62 = vpop.f32.mrb[15].mxu1  ;;  %4593 = vmatpush3.msra.mxu0 %v175_v7 }
 0x7af   :  { %4597 = vmatprep.subr.mxu0 %v174_v8  ;;  %v1603_v30 = vpop.permute.xlu0 %1602 }
 0x7b1   :  { %v1181_v63 = vpop.f32.mrb[16].mxu1 }
 0x7b2   :  { %v1263_v0 = vsel %vm5228_vm8, -10000.0, %v1181_v63  ;;  %v4606_v1 = vpop.f32.mrb[17].mxu1 }
 0x7b3   :  { %v1265_v2 = vsel %vm285_vm5, %v1263_v0, -inf  ;;  %v1523_v34 = vpop.permute.xlu0 %1522 }
 0x7b4   :  { %1266 = vmax.xlane.f32.xlu1 %v1265_v2 }
 0x7b5   :  { %v1259_v3 = vpop.f32.mrb[18].mxu1 }
 0x7b6   :  { %v1264_v4 = vsel %vm5236_vm9, -10000.0, %v1259_v3  ;;  %v4611_v5 = vpop.f32.mrb[19].mxu1 }
 0x7b7   :  { %v1268_v6 = vsel %vm285_vm5, %v1264_v4, -inf }
 0x7b8   :  { %1269 = vmax.xlane.f32.xlu1 %v1268_v6 }
 0x841   :  { %v1267_v9 = vpop.xlane.xlu1 %1266 }
 0x842   :  { %v1271_v10 = vsub.f32 %v1263_v0, %v1267_v9 }
 0x844   :  { %v1273_v11 = vmul.f32 1.442695, %v1271_v10 }
 0x845   :  { %v1270_v12 = vpop.xlane.xlu1 %1269 }
 0x846   :  { %4949 = vpow2.f32 %v1273_v11  ;;  %v1272_v13 = vsub.f32 %v1264_v4, %v1270_v12  ;;  %v177_v4 = vld [vmem:[%s5761_s6 + $0x18] sm:$0xff]  ;;  %v4306_v11 = vld [vmem:[%s5762_s7] ss:$0 sm:$0xff] }
 0x848   :  { %v1275_v14 = vmul.f32 1.442695, %v1272_v13 }
 0x84a   :  { %4951 = vpow2.f32 %v1275_v14 }
 0x850   :  { %v4950_v15 = vpop.eup %4949 }
 0x851   :  { %v1277_v16 = vsel %vm285_vm5, %v4950_v15, 0.0 }
 0x852   :  { %1278 = vadd.xlane.f32.xlu1 %v1277_v16 }
 0x854   :  { %v4952_v19 = vpop.eup %4951 }
 0x855   :  { %v1280_v21 = vsel %vm285_vm5, %v4952_v19, 0.0 }
 0x856   :  { %1281 = vadd.xlane.f32.xlu1 %v1280_v21 }
 0x867   :  { %1287 = vrot.lane.b32.xlu1 %v5194_v37, %s5047_s3 }
 0x86b   :  { %1600 = vrot.lane.b32.xlu1 %v5198_v38, %s5049_s15 }
 0x880   :  { %v865_v22 = vpop.f32.mrb[2].mxu0 }
 0x881   :  { %v4586_v23 = vpop.f32.mrb[3].mxu0  ;;  %4594 = vmatprep.mubr.msk.f32.mxu0 %vm285_vm5, %v865_v22 }
 0x882   :  { %4595 = vmatmul.mubr.msk.f32.vlgmr.msra.gmra.mrb[4].mxu0 %vm285_vm5, %v941_v61 }
 0x883   :  { %4599 = vmatprep.mubr.msk.f32.mxu0 %vm285_vm5, %v5277_v17  ;;  %4598 = vmatpush3.msra.mxu0 %v174_v8 }
 0x884   :  { %4612 = vmatprep.subr.mxu0 %v5038_v18 }
 0x88a   :  { %4600 = vmatmul.mubr.msk.f32.vlgmr.msra.gmra.mrb[4].mxu0 %vm285_vm5, %v5279_v20 }
 0x88b   :  { %4614 = vmatprep.mubr.msk.f32.mxu0 %vm5039_vm4, %v5038_v18 }
 0x8df   :  { %v1279_v24 = vpop.xlane.xlu1 %1278 }
 0x8e0   :  { %4953 = vrcp.f32 %v1279_v24 }
 0x8e3   :  { %v1282_v25 = vpop.xlane.xlu1 %1281 }
 0x8e4   :  { %4955 = vrcp.f32 %v1282_v25 }
 0x8e7   :  { %v1288_v27 = vpop.permute.xlu1 %1287 }
 0x8e8   :  { %4613 = vmatpush3.msra.mxu0 %v1288_v27 }
 0x8e9   :  { %4622 = vmatprep.subr.mxu0 %v176_v26 }
 0x8ea   :  { %v4954_v17 = vpop.eup %4953 }
 0x8eb   :  { %v1285_v29 = vmul.f32 %v4954_v17, %v4950_v15  ;;  %v1601_v41 = vpop.permute.xlu1 %1600 }
 0x8ed   :  { %4615 = vmatmul.mubr.msk.f32.vlgmr.msra.gmra.mrb[6].mxu0 %vm285_vm5, %v1285_v29 }
 0x8ee   :  { %v4956_v20 = vpop.eup %4955  ;;  %4623 = vmatpush3.msra.mxu0 %v176_v26 }
 0x8ef   :  { %v1286_v31 = vmul.f32 %v4956_v20, %v4952_v19  ;;  %4632 = vmatprep.subr.mxu0 %v5038_v18 }
 0x8f1   :  { %4620 = vmatmul.mubr.msk.f32.vlgmr.msra.gmra.mrb[20].mxu1 %vm285_vm5, %v1286_v31 }
 0x8f2   :  { %4628 = vmatpush3.xpose.msk.msra.mxu1 %vm285_vm5, %v1525_v28  ;;  %4629 = vmatprep.mubr.msk.f32.mxu1 %vm5039_vm4, %v5038_v18 }
 0x8f3   :  { %4637 = vmatprep.subr.mxu1 %v5038_v18 }
 0x8f5   :  { %4630 = vmatmul.mubr.msk.f32.vlgmr.msra.gmra.mrb[22].mxu1 %vm285_vm5, %v1523_v34  ;;  %v181_v34 = vld [vmem:[%s5763_s8 + $0x10] sm:$0xff] }
 0x8f6   :  { %4639 = vmatprep.mubr.msk.f32.mxu1 %vm5039_vm4, %v5038_v18 }
 0x9c0   :  { %v1359_v35 = vpop.f32.mrb[6].mxu0 }
 0x9c1   :  { %v4616_v36 = vpop.f32.mrb[7].mxu0  ;;  %4624 = vmatprep.mubr.msk.f32.mxu0 %vm285_vm5, %v1359_v35  ;;  %v182_v35 = vld [vmem:[%s5763_s8 + $0x18] sm:$0xff] }
 0x9c2   :  { %v4851_v36 = vpack.c.bf16 %v182_v35, %v181_v34 }
 0x9c4   :  { %v1435_v39 = vpop.f32.mrb[20].mxu1 }
 0x9c5   :  { %v4621_v40 = vpop.f32.mrb[21].mxu1  ;;  %4625 = vmatmul.mubr.msk.f32.vlgmr.msra.gmra.mrb[4].mxu0 %vm285_vm5, %v1435_v39  ;;  %v184_v39 = vld [vmem:[%s5765_s10] sm:$0xff] }
 0x9c6   :  { %4633 = vmatpush3.xpose.msk.msra.mxu0 %vm285_vm5, %v1603_v30  ;;  %4634 = vmatprep.mubr.msk.f32.mxu0 %vm5039_vm4, %v5038_v18  ;;  %v180_v30 = vld [vmem:[%s5763_s8 + $0x8] sm:$0xff] }
 0x9c7   :  { %4642 = vmatprep.subr.mxu0 %v5038_v18  ;;  %v185_v40 = vld [vmem:[%s5765_s10 + $0x8] sm:$0xff] }
 0x9c8   :  { %v1596_v43 = vpop.f32.mrb[22].mxu1 }
 0x9c9   :  { %v1678_v45 = vsel %vm5228_vm8, -10000.0, %v1596_v43  ;;  %v4631_v46 = vpop.f32.mrb[23].mxu1  ;;  %4635 = vmatmul.mubr.msk.f32.vlgmr.msra.gmra.mrb[8].mxu0 %vm285_vm5, %v1601_v41  ;;  %v186_v41 = vld [vmem:[%s5765_s10 + $0x10] sm:$0xff]  ;;  %v4855_v43 = vpack.c.bf16 %v185_v40, %v184_v39  ;;  %v4314_v39 = vld [vmem:[%s5759_s4 + $0x28] sm:$0xff] }
 0x9ca   :  { %v1680_v47 = vsel %vm285_vm5, %v1678_v45, -inf  ;;  %4644 = vmatprep.mubr.msk.f32.mxu0 %vm5039_vm4, %v5038_v18 }
 0x9cb   :  { %1681 = vmax.xlane.f32.xlu0 %v1680_v47  ;;  %v188_v47 = vld [vmem:[%s5765_s10 + $0x20] sm:$0xff] }
 0xa58   :  { %v1682_v49 = vpop.xlane.xlu0 %1681 }
 0xa59   :  { %v1686_v50 = vsub.f32 %v1678_v45, %v1682_v49  ;;  %v187_v45 = vld [vmem:[%s5765_s10 + $0x18] sm:$0xff]  ;;  %v189_v49 = vld [vmem:[%s5765_s10 + $0x28] sm:$0xff] }
 0xa5a   :  { %v4859_v46 = vpack.c.bf16 %v187_v45, %v186_v41  ;;  %v4315_v41 = vld [vmem:[%s5759_s4 + $0x30] sm:$0xff] }
 0xa5b   :  { %v1688_v51 = vmul.f32 1.442695, %v1686_v50  ;;  %v4863_v50 = vpack.c.bf16 %v189_v49, %v188_v47 }
 0xa5d   :  { %4957 = vpow2.f32 %v1688_v51 }
 0xa67   :  { %v4958_v52 = vpop.eup %4957 }
 0xa68   :  { %v1692_v53 = vsel %vm285_vm5, %v4958_v52, 0.0 }
 0xa69   :  { %1693 = vadd.xlane.f32.xlu0 %v1692_v53 }
 0xa9c   :  { %v1674_v55 = vpop.f32.mrb[8].mxu0 }
 0xa9d   :  { %v1679_v56 = vsel %vm5236_vm9, -10000.0, %v1674_v55  ;;  %v4636_v57 = vpop.f32.mrb[9].mxu0 }
 0xa9e   :  { %v1683_v58 = vsel %vm285_vm5, %v1679_v56, -inf }
 0xa9f   :  { %1684 = vmax.xlane.f32.xlu1 %v1683_v58 }
 0xab0   :  { %1702 = vrot.lane.b32.xlu1 %v5194_v37, %s5050_s21 }
 0xaf6   :  { %v1694_v59 = vpop.xlane.xlu0 %1693 }
 0xaf7   :  { %4959 = vrcp.f32 %v1694_v59 }
 0xb01   :  { %v4960_v61 = vpop.eup %4959 }
 0xb02   :  { %v1700_v0 = vmul.f32 %v4960_v61, %v4958_v52 }
 0xb2c   :  { %v1685_v60 = vpop.xlane.xlu1 %1684 }
 0xb2d   :  { %v1687_v62 = vsub.f32 %v1679_v56, %v1685_v60  ;;  %v5433_v60 = vld [vmem:[%s5767_s12] sm:$0xf] }
 0xb2e   :  { %v1973_v61 = vrot.slane %v5433_v60, %v5223_v44 }
 0xb2f   :  { %v1690_v63 = vmul.f32 1.442695, %v1687_v62  ;;  %v1984_v62 = vsub.s32 1, %v5217_v42 }
 0xb30   :  { %v1703_v1 = vpop.permute.xlu1 %1702 }
 0xb31   :  { %4961 = vpow2.f32 %v1690_v63  ;;  %4638 = vmatpush3.msra.mxu1 %v1703_v1 }
 0xb32   :  { %4640 = vmatmul.mubr.msk.f32.vlgmr.msra.gmra.mrb[24].mxu1 %vm285_vm5, %v1700_v0 }
 0xb3b   :  { %v4962_v2 = vpop.eup %4961 }
 0xb3c   :  { %v1695_v3 = vsel %vm285_vm5, %v4962_v2, 0.0 }
 0xb3d   :  { %1696 = vadd.xlane.f32.xlu0 %v1695_v3 }
 0xb53   :  { %1778 = vrot.lane.b32.xlu0 %v5198_v38, %s5050_s21 }
 0xbca   :  { %v1697_v37 = vpop.xlane.xlu0 %1696 }
 0xbcb   :  { %4963 = vrcp.f32 %v1697_v37 }
 0xbce   :  { %v1779_v5 = vpop.permute.xlu0 %1778 }
 0xbcf   :  { %4643 = vmatpush3.msra.mxu0 %v1779_v5 }
 0xbd0   :  { %4647 = vmatprep.subr.mxu0 %v177_v4 }
 0xbd5   :  { %v4964_v6 = vpop.eup %4963 }
 0xbd6   :  { %v1701_v7 = vmul.f32 %v4964_v6, %v4962_v2  ;;  %v1985_v2 = vrot.slane %v5433_v60, %v1984_v62 }
 0xbd8   :  { %4645 = vmatmul.mubr.msk.f32.vlgmr.msra.gmra.mrb[10].mxu0 %vm285_vm5, %v1701_v7  ;;  %v190_v7 = vld [vmem:[%s5765_s10 + $0x30] sm:$0xff] }
 0xbd9   :  { %4648 = vmatpush3.msra.mxu0 %v177_v4 }
 0xbda   :  { %4856 = vmatprep.subr.bf16.mxu0 %v4855_v43 }
 0xc05   :  { %v1774_v8 = vpop.f32.mrb[24].mxu1 }
 0xc06   :  { %v4641_v9 = vpop.f32.mrb[25].mxu1  ;;  %4649 = vmatprep.mubr.msk.f32.mxu0 %vm285_vm5, %v1774_v8  ;;  %v191_v8 = vld [vmem:[%s5765_s10 + $0x38] sm:$0xff] }
 0xc07   :  { %v4867_v9 = vpack.c.bf16 %v191_v8, %v190_v7 }
 0xcab   :  { %v1850_v10 = vpop.f32.mrb[10].mxu0 }
 0xcac   :  { %v4646_v38 = vpop.f32.mrb[11].mxu0  ;;  %4650 = vmatmul.mubr.msk.f32.vlgmr.msra.gmra.mrb[4].mxu0 %vm285_vm5, %v1850_v10  ;;  %v4307_v10 = vld [vmem:[%s5764_s9] ss:$0 sm:$0xff] }
 0xcad   :  { %4858 = vmatpush3.bf16.msra.mxu0 %v4855_v43  ;;  %v4316_v43 = vld [vmem:[%s5759_s4 + $0x38] sm:$0xff] }
 0xcae   :  { %4860 = vmatprep.subr.bf16.mxu0 %v4859_v46  ;;  %v4875_v45 = vpack.c.bf16 %v4316_v43, %v4315_v41 }
 0xcb1   :  { %4862 = vmatpush3.bf16.msra.mxu0 %v4859_v46 }
 0xcb2   :  { %4864 = vmatprep.subr.bf16.mxu0 %v4863_v50 }
 0xcb5   :  { %4866 = vmatpush3.bf16.msra.mxu0 %v4863_v50 }
 0xcb6   :  { %4868 = vmatprep.subr.bf16.mxu0 %v4867_v9 }
 0xcb9   :  { %4870 = vmatpush3.bf16.msra.mxu0 %v4867_v9 }
 0xcba   :  { %4703 = vmatprep.subr.mxu0 %v5038_v18 }
 0xd7f   :  { %v4651_v12 = vpop.f32.mrb[4].mxu0 }
 0xd80   :  { %v1944_v13 = vadd.f32 %v4651_v12, %v4306_v11  ;;  %v1926_v14 = vpop.f32.mrb[5].mxu0 }
 0xd81   :  { %v1943_v15 = vadd.f32 %v4306_v11, %v1926_v14 }
 0xd82   :  { %v1946_v16 = vadd.f32 %v1944_v13, %v5181_v33 }
 0xd83   :  { %v1945_v19 = vadd.f32 %v1943_v15, %v5179_v32  ;;  %v179_v32 = vld [vmem:[%s5763_s8] sm:$0xff] }
 0xd84   :  { %v1950_v21 = vsel %vm200_vm3, %v1946_v16, 0.0  ;;  %v4847_v31 = vpack.c.bf16 %v180_v30, %v179_v32 }
 0xd85   :  { %1951 = vadd.xlane.f32.xlu0 %v1950_v21  ;;  %v1947_v22 = vsel %vm200_vm3, %v1945_v19, 0.0 }
 0xd86   :  { %1948 = vadd.xlane.f32.xlu1 %v1947_v22  ;;  %4848 = vmatprep.subr.bf16.mxu1 %v4847_v31 }
 0xd87   :  { %4850 = vmatpush3.bf16.msra.mxu1 %v4847_v31 }
 0xd88   :  { %4852 = vmatprep.subr.bf16.mxu1 %v4851_v36 }
 0xd8b   :  { %4854 = vmatpush3.bf16.msra.mxu1 %v4851_v36  ;;  %v4313_v36 = vld [vmem:[%s5759_s4 + $0x20] sm:$0xff] }
 0xd8c   :  { %v4871_v40 = vpack.c.bf16 %v4314_v39, %v4313_v36 }
 0xd8e   :  { %4872 = vmatprep.subr.bf16.mxu1 %v4871_v40 }
 0xe12   :  { %v1952_v23 = vpop.xlane.xlu0 %1951 }
 0xe13   :  { %v1955_v24 = vmul.f32 0.03125, %v1952_v23  ;;  %v1949_v25 = vpop.xlane.xlu1 %1948 }
 0xe14   :  { %v1954_v26 = vmul.f32 0.03125, %v1949_v25 }
 0xe15   :  { %v1957_v27 = vsub.f32 %v1946_v16, %v1955_v24  ;;  %v4310_v16 = vld [vmem:[%s5766_s11] ss:$0 sm:$0xff] }
 0xe16   :  { %v1956_v28 = vsub.f32 %v1945_v19, %v1954_v26 }
 0xe17   :  { %v1959_v17 = vmul.f32 %v1957_v27, %v1957_v27  ;;  %v1975_v63 = vmul.f32 %v1973_v61, %v1957_v27 }
 0xe18   :  { %v1958_v29 = vmul.f32 %v1956_v28, %v1956_v28  ;;  %v1974_v1 = vmul.f32 %v1973_v61, %v1956_v28 }
 0xe19   :  { %v1963_v20 = vsel %vm200_vm3, %v1959_v17, 0.0 }
 0xe1a   :  { %1964 = vadd.xlane.f32.xlu0 %v1963_v20  ;;  %v1960_v33 = vsel %vm200_vm3, %v1958_v29, 0.0 }
 0xe1b   :  { %1961 = vadd.xlane.f32.xlu1 %v1960_v33 }
 0xea7   :  { %v1965_v51 = vpop.xlane.xlu0 %1964 }
 0xea8   :  { %v1967_v52 = vmul.f32 0.03125, %v1965_v51  ;;  %v1962_v53 = vpop.xlane.xlu1 %1961 }
 0xea9   :  { %v1966_v55 = vmul.f32 0.03125, %v1962_v53 }
 0xeaa   :  { %v1969_v56 = vmax.f32 %v1967_v52, 1e-10 }
 0xeab   :  { %v1968_v57 = vmax.f32 %v1966_v55, 1e-10 }
 0xeac   :  { %v1977_v58 = vadd.f32 1e-10, %v1969_v56  ;;  %v2190_v56 = vsub.s32 2, %v5217_v42 }
 0xead   :  { %v1976_v59 = vadd.f32 1e-10, %v1968_v57 }
 0xeae   :  { %4965 = vrsqrt.f32 %v1977_v58  ;;  %v2191_v57 = vrot.slane %v5433_v60, %v2190_v56  ;;  %v2202_v58 = vsub.s32 3, %v5217_v42 }
 0xeaf   :  { %4967 = vrsqrt.f32 %v1976_v59 }
 0xeb8   :  { %v4966_v0 = vpop.eup %4965 }
 0xeb9   :  { %v4968_v3 = vpop.eup %4967  ;;  %v1981_v37 = vmul.f32 %v4966_v0, %v1975_v63  ;;  %v2203_v0 = vrot.slane %v5433_v60, %v2202_v58  ;;  %v4338_v60 = vld [vmem:[%s5760_s5 + $0x1] ss:$0 sm:$0xff] }
 0xeba   :  { %v1980_v4 = vmul.f32 %v4968_v3, %v1974_v1 }
 0xebb   :  { %v1987_v6 = vadd.f32 %v1985_v2, %v1981_v37 }
 0xebc   :  { %v1986_v5 = vadd.f32 %v1985_v2, %v1980_v4 }
 0xebe   :  { %4660 = vmatprep.mubr.msk.f32.mxu1 %vm200_vm3, %v1986_v5 }
 0xebf   :  { %4661 = vmatmul.mubr.msk.f32.vlgmr.msra.gmra.mrb[26].mxu1 %vm200_vm3, %v1987_v6 }
 0xec0   :  { %4874 = vmatpush3.bf16.msra.mxu1 %v4871_v40 }
 0xec1   :  { %4876 = vmatprep.subr.bf16.mxu1 %v4875_v45 }
 0xec4   :  { %4878 = vmatpush3.bf16.msra.mxu1 %v4875_v45 }
 0xec5   :  { %4693 = vmatprep.subr.mxu1 %v5038_v18 }
 0xf92   :  { %v4662_v38 = vpop.f32.mrb[26].mxu1 }
 0xf93   :  { %v2072_v11 = vadd.f32 %v4662_v38, %v4307_v10  ;;  %v2066_v12 = vpop.f32.mrb[27].mxu1 }
 0xf94   :  { %v2067_v13 = vadd.f32 %v4307_v10, %v2066_v12 }
 0xf95   :  { %v2076_v15 = vmax.f32 %v2072_v11, 0.0 }
 0xf96   :  { %v2075_v14 = vmax.f32 %v2067_v13, 0.0 }
 0xf98   :  { %4679 = vmatprep.mubr.msk.f32.mxu0 %vm71_vm0, %v2075_v14 }
 0xf99   :  { %4680 = vmatmul.mubr.msk.f32.vlgmr.msra.gmra.mrb[12].mxu0 %vm71_vm0, %v2076_v15 }
 0xf9a   :  { %4705 = vmatprep.mubr.msk.f32.mxu0 %vm5039_vm4, %v5038_v18 }
0x106c   :  { %v4681_v19 = vpop.f32.mrb[12].mxu0 }
0x106d   :  { %v2161_v21 = vadd.f32 %v4681_v19, %v4310_v16  ;;  %v2155_v22 = vpop.f32.mrb[13].mxu0 }
0x106e   :  { %v2156_v23 = vadd.f32 %v4310_v16, %v2155_v22 }
0x106f   :  { %v2165_v24 = vadd.f32 %v2161_v21, %v1987_v6 }
0x1070   :  { %v2164_v25 = vadd.f32 %v2156_v23, %v1986_v5 }
0x1071   :  { %v2169_v26 = vsel %vm200_vm3, %v2165_v24, 0.0 }
0x1072   :  { %2170 = vadd.xlane.f32.xlu0 %v2169_v26  ;;  %v2166_v27 = vsel %vm200_vm3, %v2164_v25, 0.0 }
0x1073   :  { %2167 = vadd.xlane.f32.xlu1 %v2166_v27 }
0x10ff   :  { %v2171_v28 = vpop.xlane.xlu0 %2170 }
0x1100   :  { %v2173_v17 = vmul.f32 0.03125, %v2171_v28  ;;  %v2168_v29 = vpop.xlane.xlu1 %2167 }
0x1101   :  { %v2172_v20 = vmul.f32 0.03125, %v2168_v29 }
0x1102   :  { %v2175_v33 = vsub.f32 %v2165_v24, %v2173_v17 }
0x1103   :  { %v2174_v32 = vsub.f32 %v2164_v25, %v2172_v20 }
0x1104   :  { %v2177_v30 = vmul.f32 %v2175_v33, %v2175_v33  ;;  %v2193_v59 = vmul.f32 %v2191_v57, %v2175_v33 }
0x1105   :  { %v2176_v31 = vmul.f32 %v2174_v32, %v2174_v32  ;;  %v2192_v63 = vmul.f32 %v2191_v57, %v2174_v32 }
0x1106   :  { %v2181_v34 = vsel %vm200_vm3, %v2177_v30, 0.0 }
0x1107   :  { %2182 = vadd.xlane.f32.xlu0 %v2181_v34  ;;  %v2178_v35 = vsel %vm200_vm3, %v2176_v31, 0.0 }
0x1108   :  { %2179 = vadd.xlane.f32.xlu1 %v2178_v35 }
0x1194   :  { %v2183_v46 = vpop.xlane.xlu0 %2182 }
0x1195   :  { %v2185_v47 = vmul.f32 0.03125, %v2183_v46  ;;  %v2180_v49 = vpop.xlane.xlu1 %2179 }
0x1196   :  { %v2184_v50 = vmul.f32 0.03125, %v2180_v49 }
0x1197   :  { %v2187_v51 = vmax.f32 %v2185_v47, 1e-10 }
0x1198   :  { %v2186_v52 = vmax.f32 %v2184_v50, 1e-10 }
0x1199   :  { %v2195_v53 = vadd.f32 1e-10, %v2187_v51 }
0x119a   :  { %v2194_v55 = vadd.f32 1e-10, %v2186_v52 }
0x119b   :  { %4969 = vrsqrt.f32 %v2195_v53 }
0x119c   :  { %4971 = vrsqrt.f32 %v2194_v55 }
0x11a5   :  { %v4970_v61 = vpop.eup %4969 }
0x11a6   :  { %v4972_v1 = vpop.eup %4971  ;;  %v2199_v2 = vmul.f32 %v4970_v61, %v2193_v59 }
0x11a7   :  { %v2198_v3 = vmul.f32 %v4972_v1, %v2192_v63 }
0x11a8   :  { %v5487_v4 = vadd.f32 %v2203_v0, %v2199_v2 }
0x11a9   :  { %v5485_v37 = vadd.f32 %v2203_v0, %v2198_v3 }
0x11ab   :  { %4690 = vmatprep.mubr.msk.f32.mxu1 %vm200_vm3, %v5485_v37 }
0x11ac   :  { %4691 = vmatmul.mubr.msk.f32.vlgmr.msra.gmra.mrb[28].mxu1 %vm200_vm3, %v5487_v4 }
0x11ad   :  { %4695 = vmatprep.mubr.msk.f32.mxu1 %vm5039_vm4, %v5038_v18 }
0x127f   :  { %v4692_v5 = vpop.f32.mrb[28].mxu1 }
0x1280   :  { %v5498_v6 = vadd.f32 %v4692_v5, %v4338_v60  ;;  %v2318_v7 = vpop.f32.mrb[29].mxu1 }
0x1281   :  { %v5500_v8 = vadd.f32 %v4338_v60, %v2318_v7 }
0x1282   :  { %2405 = vrot.lane.b32.xlu0 %v5498_v6, %s5040_s22 }
0x1283   :  { %2328 = vrot.lane.b32.xlu1 %v5500_v8, %s5040_s22 }
0x12f4   :  { %v2406_v10 = vpop.permute.xlu0 %2405 }
0x12f5   :  { %v2329_v9 = vpop.permute.xlu1 %2328 }
0x12f6   :  { %4694 = vmatpush3.xpose.msk.msra.mxu1 %vm285_vm5, %v2329_v9 }
0x12f7   :  { %4698 = vmatprep.subr.mxu1 %v5038_v18 }
0x12f9   :  { %4696 = vmatmul.mubr.msk.f32.vlgmr.msra.gmra.mrb[30].mxu1 %vm285_vm5, %v5500_v8 }
0x12fa   :  { %4699 = vmatpush3.xpose.msk.msra.mxu1 %vm285_vm5, %v2406_v10  ;;  %4700 = vmatprep.mubr.msk.f32.mxu1 %vm5039_vm4, %v5038_v18 }
0x12fb   :  { %4708 = vmatprep.subr.mxu1 %v5038_v18 }
0x12fd   :  { %4701 = vmatmul.mubr.msk.f32.vlgmr.msra.gmra.mrb[32].mxu1 %vm285_vm5, %v5498_v6 }
0x12fe   :  { %4710 = vmatprep.mubr.msk.f32.mxu1 %vm5039_vm4, %v5038_v18 }
0x13cc   :  { %v2400_v38 = vpop.f32.mrb[30].mxu1 }
0x13cd   :  { %v4697_v11 = vpop.f32.mrb[31].mxu1  ;;  %v2481_v16 = vsel %vm5228_vm8, -10000.0, %v2400_v38 }
0x13ce   :  { %v2483_v19 = vsel %vm285_vm5, %v2481_v16, -inf }
0x13d0   :  { %v2477_v12 = vpop.f32.mrb[32].mxu1 }
0x13d1   :  { %v2482_v13 = vsel %vm5236_vm9, -10000.0, %v2477_v12  ;;  %v4702_v14 = vpop.f32.mrb[33].mxu1 }
0x13d2   :  { %v2486_v15 = vsel %vm285_vm5, %v2482_v13, -inf }
0x13d3   :  { %2487 = vmax.xlane.f32.xlu1 %v2486_v15 }
0x13e4   :  { %2581 = vrot.lane.b32.xlu1 %v5498_v6, %s5041_s2 }
0x13e8   :  { %2735 = vrot.lane.b32.xlu1 %v5498_v6, %s5043_s27 }
0x140c   :  { %2484 = vmax.xlane.f32.xlu1 %v2483_v19 }
0x141d   :  { %2659 = vrot.lane.b32.xlu1 %v5500_v8, %s5042_s26 }
0x1421   :  { %2657 = vrot.lane.b32.xlu1 %v5500_v8, %s5043_s27 }
0x1425   :  { %3153 = vrot.lane.b32.xlu1 %v5500_v8, %s5044_s28 }
0x1460   :  { %v2488_v21 = vpop.xlane.xlu1 %2487 }
0x1461   :  { %v2490_v22 = vsub.f32 %v2482_v13, %v2488_v21 }
0x1463   :  { %v2493_v23 = vmul.f32 1.442695, %v2490_v22 }
0x1464   :  { %v2582_v24 = vpop.permute.xlu1 %2581 }
0x1465   :  { %4973 = vpow2.f32 %v2493_v23  ;;  %4709 = vmatpush3.msra.mxu1 %v2582_v24 }
0x1466   :  { %4718 = vmatprep.subr.mxu1 %v5038_v18 }
0x1468   :  { %v2736_v27 = vpop.permute.xlu1 %2735 }
0x146f   :  { %v4974_v25 = vpop.eup %4973 }
0x1470   :  { %v2498_v26 = vsel %vm285_vm5, %v4974_v25, 0.0 }
0x1471   :  { %2499 = vadd.xlane.f32.xlu0 %v2498_v26 }
0x1487   :  { %2737 = vrot.lane.b32.xlu0 %v5498_v6, %s5042_s26 }
0x1499   :  { %v2485_v28 = vpop.xlane.xlu1 %2484 }
0x149a   :  { %v2489_v17 = vsub.f32 %v2481_v16, %v2485_v28 }
0x149c   :  { %v2491_v29 = vmul.f32 1.442695, %v2489_v17 }
0x149d   :  { %v2660_v40 = vpop.permute.xlu1 %2659 }
0x149e   :  { %4975 = vpow2.f32 %v2491_v29 }
0x14a1   :  { %v2658_v43 = vpop.permute.xlu1 %2657 }
0x14a5   :  { %v3154_v5 = vpop.permute.xlu1 %3153 }
0x14a8   :  { %v4976_v20 = vpop.eup %4975 }
0x14a9   :  { %v2495_v33 = vsel %vm285_vm5, %v4976_v20, 0.0 }
0x14aa   :  { %2496 = vadd.xlane.f32.xlu0 %v2495_v33 }
0x14c0   :  { %2505 = vrot.lane.b32.xlu0 %v5500_v8, %s5041_s2 }
0x14fe   :  { %v2500_v32 = vpop.xlane.xlu0 %2499 }
0x14ff   :  { %4977 = vrcp.f32 %v2500_v32 }
0x1502   :  { %v2738_v34 = vpop.permute.xlu0 %2737 }
0x1509   :  { %v4978_v30 = vpop.eup %4977 }
0x150a   :  { %v2504_v31 = vmul.f32 %v4978_v30, %v4974_v25 }
0x150c   :  { %4711 = vmatmul.mubr.msk.f32.vlgmr.msra.gmra.mrb[34].mxu1 %vm285_vm5, %v2504_v31 }
0x150d   :  { %4719 = vmatpush3.xpose.msk.msra.mxu1 %vm285_vm5, %v2738_v34  ;;  %4720 = vmatprep.mubr.msk.f32.mxu1 %vm5039_vm4, %v5038_v18  ;;  %v4319_v34 = vld [vmem:[%s5761_s6 + $0x28] sm:$0xff] }
0x150e   :  { %4728 = vmatprep.subr.mxu1 %v5038_v18 }
0x1510   :  { %4721 = vmatmul.mubr.msk.f32.vlgmr.msra.gmra.mrb[36].mxu1 %vm285_vm5, %v2736_v27 }
0x1511   :  { %4730 = vmatprep.mubr.msk.f32.mxu1 %vm5039_vm4, %v5038_v18 }
0x1537   :  { %v2497_v35 = vpop.xlane.xlu0 %2496 }
0x1538   :  { %4979 = vrcp.f32 %v2497_v35  ;;  %v4318_v35 = vld [vmem:[%s5761_s6 + $0x20] sm:$0xff] }
0x153b   :  { %v2506_v36 = vpop.permute.xlu0 %2505 }
0x153c   :  { %4704 = vmatpush3.msra.mxu0 %v2506_v36 }
0x153d   :  { %4713 = vmatprep.subr.mxu0 %v5038_v18 }
0x1542   :  { %v4980_v39 = vpop.eup %4979 }
0x1543   :  { %v2503_v41 = vmul.f32 %v4980_v39, %v4976_v20 }
0x1545   :  { %4706 = vmatmul.mubr.msk.f32.vlgmr.msra.gmra.mrb[14].mxu0 %vm285_vm5, %v2503_v41 }
0x1546   :  { %4714 = vmatpush3.xpose.msk.msra.mxu0 %vm285_vm5, %v2660_v40  ;;  %4715 = vmatprep.mubr.msk.f32.mxu0 %vm5039_vm4, %v5038_v18 }
0x1547   :  { %4723 = vmatprep.subr.mxu0 %v5038_v18 }
0x1549   :  { %4716 = vmatmul.mubr.msk.f32.vlgmr.msra.gmra.mrb[16].mxu0 %vm285_vm5, %v2658_v43 }
0x154a   :  { %4725 = vmatprep.mubr.msk.f32.mxu0 %vm5039_vm4, %v5038_v18 }
0x15df   :  { %v5558_v45 = vpop.f32.mrb[34].mxu1 }
0x15e0   :  { %v4712_v46 = vpop.f32.mrb[35].mxu1 }
0x15e3   :  { %v2809_v47 = vpop.f32.mrb[36].mxu1 }
0x15e4   :  { %v2814_v49 = vsel %vm5236_vm9, -10000.0, %v2809_v47  ;;  %v4722_v50 = vpop.f32.mrb[37].mxu1 }
0x15e5   :  { %v2818_v51 = vsel %vm285_vm5, %v2814_v49, -inf }
0x15e6   :  { %2819 = vmax.xlane.f32.xlu0 %v2818_v51 }
0x15fc   :  { %2913 = vrot.lane.b32.xlu0 %v5498_v6, %s5045_s29 }
0x1600   :  { %3151 = vrot.lane.b32.xlu0 %v5500_v8, %s5046_s30 }
0x1604   :  { %3229 = vrot.lane.b32.xlu0 %v5498_v6, %s5046_s30 }
0x1618   :  { %v5569_v52 = vpop.f32.mrb[14].mxu0 }
0x1619   :  { %v4707_v53 = vpop.f32.mrb[15].mxu0 }
0x161c   :  { %v2731_v55 = vpop.f32.mrb[16].mxu0 }
0x161d   :  { %v4717_v57 = vpop.f32.mrb[17].mxu0  ;;  %v2813_v3 = vsel %vm5228_vm8, -10000.0, %v2731_v55 }
0x161e   :  { %v2815_v60 = vsel %vm285_vm5, %v2813_v3, -inf }
0x1673   :  { %v2820_v59 = vpop.xlane.xlu0 %2819 }
0x1674   :  { %v2822_v61 = vsub.f32 %v2814_v49, %v2820_v59 }
0x1676   :  { %v2825_v63 = vmul.f32 1.442695, %v2822_v61  ;;  %v4320_v61 = vld [vmem:[%s5761_s6 + $0x30] sm:$0xff] }
0x1677   :  { %v2914_v0 = vpop.permute.xlu0 %2913 }
0x1678   :  { %4981 = vpow2.f32 %v2825_v63  ;;  %4729 = vmatpush3.msra.mxu1 %v2914_v0 }
0x1679   :  { %4743 = vmatprep.subr.mxu1 %v5038_v18 }
0x167b   :  { %v3152_v38 = vpop.permute.xlu0 %3151 }
0x167f   :  { %v3230_v12 = vpop.permute.xlu0 %3229 }
0x1682   :  { %v4982_v1 = vpop.eup %4981 }
0x1683   :  { %v2830_v2 = vsel %vm285_vm5, %v4982_v1, 0.0 }
0x1684   :  { %2831 = vadd.xlane.f32.xlu1 %v2830_v2 }
0x1695   :  { %3231 = vrot.lane.b32.xlu1 %v5498_v6, %s5044_s28 }
0x16b9   :  { %2816 = vmax.xlane.f32.xlu1 %v2815_v60 }
0x1711   :  { %v2832_v7 = vpop.xlane.xlu1 %2831 }
0x1712   :  { %4983 = vrcp.f32 %v2832_v7 }
0x1715   :  { %v3232_v11 = vpop.permute.xlu1 %3231 }
0x171c   :  { %v4984_v9 = vpop.eup %4983 }
0x171d   :  { %v2836_v10 = vmul.f32 %v4984_v9, %v4982_v1 }
0x171f   :  { %4731 = vmatmul.mubr.msk.f32.vlgmr.msra.gmra.mrb[38].mxu1 %vm285_vm5, %v2836_v10 }
0x1720   :  { %4744 = vmatpush3.xpose.msk.msra.mxu1 %vm285_vm5, %v3154_v5  ;;  %4745 = vmatprep.mubr.msk.f32.mxu1 %vm5039_vm4, %v5038_v18 }
0x1721   :  { %4748 = vmatprep.subr.mxu1 %v5038_v18 }
0x1723   :  { %4746 = vmatmul.mubr.msk.f32.vlgmr.msra.gmra.mrb[40].mxu1 %vm285_vm5, %v3152_v38 }
0x1724   :  { %4749 = vmatpush3.xpose.msk.msra.mxu1 %vm285_vm5, %v3232_v11  ;;  %4750 = vmatprep.mubr.msk.f32.mxu1 %vm5039_vm4, %v5038_v18 }
0x1725   :  { %4758 = vmatprep.subr.mxu1 %v5038_v18 }
0x1727   :  { %4751 = vmatmul.mubr.msk.f32.vlgmr.msra.gmra.mrb[42].mxu1 %vm285_vm5, %v3230_v12 }
0x1728   :  { %4760 = vmatprep.mubr.msk.f32.mxu1 %vm5039_vm4, %v5038_v18 }
0x1746   :  { %v2817_v13 = vpop.xlane.xlu1 %2816 }
0x1747   :  { %v2821_v14 = vsub.f32 %v2813_v3, %v2817_v13 }
0x1749   :  { %v2823_v15 = vmul.f32 1.442695, %v2821_v14 }
0x174b   :  { %4985 = vpow2.f32 %v2823_v15 }
0x1755   :  { %v4986_v16 = vpop.eup %4985 }
0x1756   :  { %v2827_v19 = vsel %vm285_vm5, %v4986_v16, 0.0 }
0x1757   :  { %2828 = vadd.xlane.f32.xlu0 %v2827_v19 }
0x176d   :  { %2837 = vrot.lane.b32.xlu0 %v5500_v8, %s5045_s29 }
0x1771   :  { %3407 = vrot.lane.b32.xlu0 %v5498_v6, %s5047_s3 }
0x1775   :  { %3568 = vrot.lane.b32.xlu0 %v5500_v8, %s5048_s14 }
0x1779   :  { %3646 = vrot.lane.b32.xlu0 %v5498_v6, %s5048_s14 }
0x177d   :  { %3566 = vrot.lane.b32.xlu0 %v5500_v8, %s5049_s15 }
0x17e4   :  { %v2829_v21 = vpop.xlane.xlu0 %2828 }
0x17e5   :  { %4987 = vrcp.f32 %v2829_v21 }
0x17e8   :  { %v2838_v22 = vpop.permute.xlu0 %2837 }
0x17e9   :  { %4724 = vmatpush3.msra.mxu0 %v2838_v22 }
0x17ea   :  { %4733 = vmatprep.subr.mxu0 %v4319_v34 }
0x17ec   :  { %v3408_v23 = vpop.permute.xlu0 %3407 }
0x17ed   :  { %4759 = vmatpush3.msra.mxu1 %v3408_v23 }
0x17ee   :  { %4768 = vmatprep.subr.mxu1 %v5038_v18 }
0x17ef   :  { %v4988_v24 = vpop.eup %4987 }
0x17f0   :  { %v2835_v25 = vmul.f32 %v4988_v24, %v4986_v16  ;;  %v3569_v0 = vpop.permute.xlu0 %3568 }
0x17f2   :  { %4726 = vmatmul.mubr.msk.f32.vlgmr.msra.gmra.mrb[18].mxu0 %vm285_vm5, %v2835_v25  ;;  %v2985_v26 = vpop.f32.mrb[38].mxu1 }
0x17f3   :  { %v4732_v27 = vpop.f32.mrb[39].mxu1  ;;  %4734 = vmatpush3.msra.mxu0 %v4319_v34 }
0x17f4   :  { %4738 = vmatprep.subr.mxu0 %v4318_v35  ;;  %v3647_v2 = vpop.permute.xlu0 %3646 }
0x17f6   :  { %v3225_v28 = vpop.f32.mrb[40].mxu1 }
0x17f7   :  { %v3307_v17 = vsel %vm5228_vm8, -10000.0, %v3225_v28  ;;  %v4747_v29 = vpop.f32.mrb[41].mxu1 }
0x17f8   :  { %v3309_v20 = vsel %vm285_vm5, %v3307_v17, -inf  ;;  %v3567_v60 = vpop.permute.xlu0 %3566 }
0x17f9   :  { %3310 = vmax.xlane.f32.xlu1 %v3309_v20 }
0x17fa   :  { %v3303_v33 = vpop.f32.mrb[42].mxu1 }
0x17fb   :  { %v3308_v32 = vsel %vm5236_vm9, -10000.0, %v3303_v33  ;;  %v4752_v30 = vpop.f32.mrb[43].mxu1 }
0x17fc   :  { %v3312_v31 = vsel %vm285_vm5, %v3308_v32, -inf }
0x17fd   :  { %3313 = vmax.xlane.f32.xlu1 %v3312_v31 }
0x1886   :  { %v3311_v36 = vpop.xlane.xlu1 %3310 }
0x1887   :  { %v3315_v39 = vsub.f32 %v3307_v17, %v3311_v36 }
0x1889   :  { %v3317_v40 = vmul.f32 1.442695, %v3315_v39 }
0x188a   :  { %v3314_v41 = vpop.xlane.xlu1 %3313 }
0x188b   :  { %4989 = vpow2.f32 %v3317_v40  ;;  %v3316_v43 = vsub.f32 %v3308_v32, %v3314_v41  ;;  %v4321_v32 = vld [vmem:[%s5761_s6 + $0x38] sm:$0xff]  ;;  %v4373_v40 = vld [vmem:[%s5762_s7 + $0x1] ss:$0 sm:$0xff] }
0x188d   :  { %v3319_v46 = vmul.f32 1.442695, %v3316_v43 }
0x188f   :  { %4991 = vpow2.f32 %v3319_v46 }
0x1895   :  { %v4990_v47 = vpop.eup %4989 }
0x1896   :  { %v3321_v49 = vsel %vm285_vm5, %v4990_v47, 0.0 }
0x1897   :  { %3322 = vadd.xlane.f32.xlu1 %v3321_v49 }
0x1899   :  { %v4992_v50 = vpop.eup %4991 }
0x189a   :  { %v3324_v51 = vsel %vm285_vm5, %v4992_v50, 0.0 }
0x189b   :  { %3325 = vadd.xlane.f32.xlu1 %v3324_v51 }
0x18ac   :  { %3331 = vrot.lane.b32.xlu1 %v5500_v8, %s5047_s3 }
0x18b0   :  { %3644 = vrot.lane.b32.xlu1 %v5498_v6, %s5049_s15 }
0x18c5   :  { %v2909_v53 = vpop.f32.mrb[18].mxu0 }
0x18c6   :  { %v4727_v55 = vpop.f32.mrb[19].mxu0  ;;  %4735 = vmatprep.mubr.msk.f32.mxu0 %vm285_vm5, %v2909_v53 }
0x18c7   :  { %4736 = vmatmul.mubr.msk.f32.vlgmr.msra.gmra.mrb[20].mxu0 %vm285_vm5, %v2985_v26 }
0x18c8   :  { %4740 = vmatprep.mubr.msk.f32.mxu0 %vm285_vm5, %v5569_v52  ;;  %4739 = vmatpush3.msra.mxu0 %v4318_v35 }
0x18c9   :  { %4753 = vmatprep.subr.mxu0 %v5038_v18 }
0x18cf   :  { %4741 = vmatmul.mubr.msk.f32.vlgmr.msra.gmra.mrb[20].mxu0 %vm285_vm5, %v5558_v45 }
0x18d0   :  { %4755 = vmatprep.mubr.msk.f32.mxu0 %vm5039_vm4, %v5038_v18 }
0x1924   :  { %v3323_v57 = vpop.xlane.xlu1 %3322 }
0x1925   :  { %4993 = vrcp.f32 %v3323_v57 }
0x1928   :  { %v3326_v59 = vpop.xlane.xlu1 %3325 }
0x1929   :  { %4995 = vrcp.f32 %v3326_v59 }
0x192c   :  { %v3332_v63 = vpop.permute.xlu1 %3331 }
0x192d   :  { %4754 = vmatpush3.msra.mxu0 %v3332_v63 }
0x192e   :  { %4763 = vmatprep.subr.mxu0 %v4320_v61 }
0x192f   :  { %v4994_v52 = vpop.eup %4993 }
0x1930   :  { %v3329_v1 = vmul.f32 %v4994_v52, %v4990_v47  ;;  %v3645_v38 = vpop.permute.xlu1 %3644 }
0x1932   :  { %4756 = vmatmul.mubr.msk.f32.vlgmr.msra.gmra.mrb[22].mxu0 %vm285_vm5, %v3329_v1 }
0x1933   :  { %v4996_v45 = vpop.eup %4995  ;;  %4764 = vmatpush3.msra.mxu0 %v4320_v61 }
0x1934   :  { %v3330_v3 = vmul.f32 %v4996_v45, %v4992_v50  ;;  %4773 = vmatprep.subr.mxu0 %v5038_v18 }
0x1936   :  { %4761 = vmatmul.mubr.msk.f32.vlgmr.msra.gmra.mrb[44].mxu1 %vm285_vm5, %v3330_v3 }
0x1937   :  { %4769 = vmatpush3.xpose.msk.msra.mxu1 %vm285_vm5, %v3569_v0  ;;  %4770 = vmatprep.mubr.msk.f32.mxu1 %vm5039_vm4, %v5038_v18 }
0x1938   :  { %4778 = vmatprep.subr.mxu1 %v5038_v18 }
0x193a   :  { %4771 = vmatmul.mubr.msk.f32.vlgmr.msra.gmra.mrb[46].mxu1 %vm285_vm5, %v3567_v60  ;;  %v4325_v60 = vld [vmem:[%s5763_s8 + $0x30] sm:$0xff] }
0x193b   :  { %4780 = vmatprep.mubr.msk.f32.mxu1 %vm5039_vm4, %v5038_v18 }
0x1a05   :  { %v3403_v5 = vpop.f32.mrb[22].mxu0 }
0x1a06   :  { %v4757_v7 = vpop.f32.mrb[23].mxu0  ;;  %4765 = vmatprep.mubr.msk.f32.mxu0 %vm285_vm5, %v3403_v5  ;;  %v4326_v5 = vld [vmem:[%s5763_s8 + $0x38] sm:$0xff] }
0x1a07   :  { %v4883_v7 = vpack.c.bf16 %v4326_v5, %v4325_v60 }
0x1a09   :  { %v3479_v9 = vpop.f32.mrb[44].mxu1 }
0x1a0a   :  { %v4762_v10 = vpop.f32.mrb[45].mxu1  ;;  %4766 = vmatmul.mubr.msk.f32.vlgmr.msra.gmra.mrb[20].mxu0 %vm285_vm5, %v3479_v9  ;;  %v4328_v9 = vld [vmem:[%s5765_s10 + $0x40] sm:$0xff] }
0x1a0b   :  { %4774 = vmatpush3.xpose.msk.msra.mxu0 %vm285_vm5, %v3647_v2  ;;  %4775 = vmatprep.mubr.msk.f32.mxu0 %vm5039_vm4, %v5038_v18  ;;  %v4324_v2 = vld [vmem:[%s5763_s8 + $0x28] sm:$0xff] }
0x1a0c   :  { %4783 = vmatprep.subr.mxu0 %v5038_v18  ;;  %v4329_v10 = vld [vmem:[%s5765_s10 + $0x48] sm:$0xff] }
0x1a0d   :  { %v3640_v11 = vpop.f32.mrb[46].mxu1 }
0x1a0e   :  { %v3722_v12 = vsel %vm5228_vm8, -10000.0, %v3640_v11  ;;  %v4772_v13 = vpop.f32.mrb[47].mxu1  ;;  %4776 = vmatmul.mubr.msk.f32.vlgmr.msra.gmra.mrb[24].mxu0 %vm285_vm5, %v3645_v38  ;;  %v4330_v38 = vld [vmem:[%s5765_s10 + $0x50] sm:$0xff]  ;;  %v4887_v11 = vpack.c.bf16 %v4329_v10, %v4328_v9 }
0x1a0f   :  { %v3724_v14 = vsel %vm285_vm5, %v3722_v12, -inf  ;;  %4785 = vmatprep.mubr.msk.f32.mxu0 %vm5039_vm4, %v5038_v18 }
0x1a10   :  { %3725 = vmax.xlane.f32.xlu0 %v3724_v14  ;;  %v4332_v14 = vld [vmem:[%s5765_s10 + $0x60] sm:$0xff] }
0x1a9d   :  { %v3726_v15 = vpop.xlane.xlu0 %3725 }
0x1a9e   :  { %v3730_v16 = vsub.f32 %v3722_v12, %v3726_v15  ;;  %v4331_v12 = vld [vmem:[%s5765_s10 + $0x58] sm:$0xff]  ;;  %v4333_v15 = vld [vmem:[%s5765_s10 + $0x68] sm:$0xff] }
0x1a9f   :  { %v4891_v13 = vpack.c.bf16 %v4331_v12, %v4330_v38 }
0x1aa0   :  { %v3732_v19 = vmul.f32 1.442695, %v3730_v16  ;;  %v4895_v16 = vpack.c.bf16 %v4333_v15, %v4332_v14 }
0x1aa2   :  { %4997 = vpow2.f32 %v3732_v19 }
0x1aac   :  { %v4998_v21 = vpop.eup %4997 }
0x1aad   :  { %v3736_v22 = vsel %vm285_vm5, %v4998_v21, 0.0 }
0x1aae   :  { %3737 = vadd.xlane.f32.xlu0 %v3736_v22 }
0x1ae1   :  { %v3718_v23 = vpop.f32.mrb[24].mxu0 }
0x1ae2   :  { %v3723_v48 = vsel %vm5236_vm9, -10000.0, %v3718_v23  ;;  %v4777_v24 = vpop.f32.mrb[25].mxu0 }
0x1ae3   :  { %v3727_v25 = vsel %vm285_vm5, %v3723_v48, -inf }
0x1ae4   :  { %3728 = vmax.xlane.f32.xlu1 %v3727_v25 }
0x1af5   :  { %3746 = vrot.lane.b32.xlu1 %v5500_v8, %s5050_s21 }
0x1b3b   :  { %v3738_v18 = vpop.xlane.xlu0 %3737 }
0x1b3c   :  { %4999 = vrcp.f32 %v3738_v18 }
0x1b46   :  { %v5000_v27 = vpop.eup %4999 }
0x1b47   :  { %v3744_v29 = vmul.f32 %v5000_v27, %v4998_v21 }
0x1b71   :  { %v3729_v26 = vpop.xlane.xlu1 %3728 }
0x1b72   :  { %v3731_v28 = vsub.f32 %v3723_v48, %v3729_v26  ;;  %v4337_v26 = vld [vmem:[%s5767_s12 + $0x4] sm:$0xf] }
0x1b73   :  { %v4016_v27 = vrot.slane %v4337_v26, %v5223_v44  ;;  %v4335_v44 = vld [vmem:[%s5765_s10 + $0x78] sm:$0xff]  ;;  %v4234_v12 = vrot.slane %v4337_v26, %v2190_v56  ;;  %v4246_v14 = vrot.slane %v4337_v26, %v2202_v58 }
0x1b74   :  { %v3734_v17 = vmul.f32 1.442695, %v3731_v28 }
0x1b75   :  { %v3747_v20 = vpop.permute.xlu1 %3746 }
0x1b76   :  { %5001 = vpow2.f32 %v3734_v17  ;;  %4779 = vmatpush3.msra.mxu1 %v3747_v20  ;;  %v4028_v20 = vrot.slane %v4337_v26, %v1984_v62  ;;  %v4374_v62 = vld [vmem:[%s5764_s9 + $0x1] ss:$0 sm:$0xff]  ;;  %s5051_s9 = smov [#allocation2]  }
0x1b77   :  { %4781 = vmatmul.mubr.msk.f32.vlgmr.msra.gmra.mrb[48].mxu1 %vm285_vm5, %v3744_v29 }
0x1b80   :  { %v5002_v54 = vpop.eup %5001 }
0x1b81   :  { %v3739_v33 = vsel %vm285_vm5, %v5002_v54, 0.0 }
0x1b82   :  { %3740 = vadd.xlane.f32.xlu0 %v3739_v33 }
0x1b98   :  { %3822 = vrot.lane.b32.xlu0 %v5498_v6, %s5050_s21 }
0x1c0f   :  { %v3741_v8 = vpop.xlane.xlu0 %3740 }
0x1c10   :  { %5003 = vrcp.f32 %v3741_v8 }
0x1c13   :  { %v3823_v30 = vpop.permute.xlu0 %3822 }
0x1c14   :  { %4784 = vmatpush3.msra.mxu0 %v3823_v30 }
0x1c15   :  { %4788 = vmatprep.subr.mxu0 %v4321_v32 }
0x1c1a   :  { %v5004_v31 = vpop.eup %5003 }
0x1c1b   :  { %v3745_v34 = vmul.f32 %v5004_v31, %v5002_v54  ;;  %v4334_v31 = vld [vmem:[%s5765_s10 + $0x70] sm:$0xff]  ;;  %s4256_s10 = sshll.u32 %s5051_s9, 4  ;;  %s4257_s10 = int_to_ptr.vmem [resolvable:$true] %s4256_s10 }
0x1c1c   :  { %p5018_p1 = scmp.lt.s32.totalorder %s4257_s10, %s4257_s10 }
0x1c1d   :  { %4786 = vmatmul.mubr.msk.f32.vlgmr.msra.gmra.mrb[26].mxu0 %vm285_vm5, %v3745_v34  ;;  %v4899_v34 = vpack.c.bf16 %v4335_v44, %v4334_v31 }
0x1c1e   :  { %4789 = vmatpush3.msra.mxu0 %v4321_v32 }
0x1c1f   :  { %4888 = vmatprep.subr.bf16.mxu0 %v4887_v11 }
0x1c4a   :  { %v3818_v35 = vpop.f32.mrb[48].mxu1 }
0x1c4b   :  { %v4782_v36 = vpop.f32.mrb[49].mxu1  ;;  %4790 = vmatprep.mubr.msk.f32.mxu0 %vm285_vm5, %v3818_v35 }
0x1cf0   :  { %v3894_v39 = vpop.f32.mrb[26].mxu0 }
0x1cf1   :  { %v4787_v6 = vpop.f32.mrb[27].mxu0  ;;  %4791 = vmatmul.mubr.msk.f32.vlgmr.msra.gmra.mrb[20].mxu0 %vm285_vm5, %v3894_v39 }
0x1cf2   :  { %4890 = vmatpush3.bf16.msra.mxu0 %v4887_v11 }
0x1cf3   :  { %4892 = vmatprep.subr.bf16.mxu0 %v4891_v13 }
0x1cf6   :  { %4894 = vmatpush3.bf16.msra.mxu0 %v4891_v13 }
0x1cf7   :  { %4896 = vmatprep.subr.bf16.mxu0 %v4895_v16 }
0x1cfa   :  { %4898 = vmatpush3.bf16.msra.mxu0 %v4895_v16 }
0x1cfb   :  { %4900 = vmatprep.subr.bf16.mxu0 %v4899_v34 }
0x1cfe   :  { %4902 = vmatpush3.bf16.msra.mxu0 %v4899_v34 }
0x1dc4   :  { %v4792_v41 = vpop.f32.mrb[20].mxu0 }
0x1dc5   :  { %v3988_v43 = vadd.f32 %v4792_v41, %v4373_v40  ;;  %v3970_v46 = vpop.f32.mrb[21].mxu0 }
0x1dc6   :  { %v3987_v47 = vadd.f32 %v4373_v40, %v3970_v46 }
0x1dc7   :  { %v3990_v49 = vadd.f32 %v3988_v43, %v5487_v4  ;;  %v4377_v43 = vld [vmem:[%s5766_s11 + $0x1] ss:$0 sm:$0xff]  ;;  %s5013_s11 = scalar_lea.vmem %s4257_s10, 256 }
0x1dc8   :  { %v3989_v50 = vadd.f32 %v3987_v47, %v5485_v37  ;;  %v4323_v37 = vld [vmem:[%s5763_s8 + $0x20] sm:$0xff]  ;;  %p5014_p0 = scmp.ne.s32.totalorder %s4257_s10, %s5013_s11  ;;  %p5019_p2 = scmp.lt.s32.totalorder %s5013_s11, %s5013_s11 }
0x1dc9   :  { %v3994_v51 = vsel %vm200_vm3, %v3990_v49, 0.0  ;;  %v4879_v3 = vpack.c.bf16 %v4324_v2, %v4323_v37 }
0x1dca   :  { %3995 = vadd.xlane.f32.xlu0 %v3994_v51  ;;  %v3991_v53 = vsel %vm200_vm3, %v3989_v50, 0.0  ;;  %p5020_p3 = por %p5019_p2, %p5018_p1 }
0x1dcb   :  { %3992 = vadd.xlane.f32.xlu1 %v3991_v53  ;;  %4880 = vmatprep.subr.bf16.mxu1 %v4879_v3 }
0x1dcc   :  { %4882 = vmatpush3.bf16.msra.mxu1 %v4879_v3  ;;  %p5021_p4 = pnand %p5020_p3, %p5014_p0 }
0x1dcd   :  { %4884 = vmatprep.subr.bf16.mxu1 %v4883_v7 }
0x1dd0   :  { %4886 = vmatpush3.bf16.msra.mxu1 %v4883_v7 }
0x1e57   :  { %v3996_v55 = vpop.xlane.xlu0 %3995 }
0x1e58   :  { %v3998_v57 = vmul.f32 0.03125, %v3996_v55  ;;  %v3993_v59 = vpop.xlane.xlu1 %3992 }
0x1e59   :  { %v3997_v61 = vmul.f32 0.03125, %v3993_v59 }
0x1e5a   :  { %v4000_v63 = vsub.f32 %v3990_v49, %v3998_v57 }
0x1e5b   :  { %v3999_v0 = vsub.f32 %v3989_v50, %v3997_v61 }
0x1e5c   :  { %v4002_v52 = vmul.f32 %v4000_v63, %v4000_v63  ;;  %v4018_v28 = vmul.f32 %v4016_v27, %v4000_v63 }
0x1e5d   :  { %v4001_v1 = vmul.f32 %v3999_v0, %v3999_v0  ;;  %v4017_v29 = vmul.f32 %v4016_v27, %v3999_v0 }
0x1e5e   :  { %v4006_v45 = vsel %vm200_vm3, %v4002_v52, 0.0 }
0x1e5f   :  { %4007 = vadd.xlane.f32.xlu0 %v4006_v45  ;;  %v4003_v4 = vsel %vm200_vm3, %v4001_v1, 0.0 }
0x1e60   :  { %4004 = vadd.xlane.f32.xlu1 %v4003_v4 }
0x1eec   :  { %v4008_v19 = vpop.xlane.xlu0 %4007 }
0x1eed   :  { %v4010_v21 = vmul.f32 0.03125, %v4008_v19  ;;  %v4005_v22 = vpop.xlane.xlu1 %4004 }
0x1eee   :  { %v4009_v23 = vmul.f32 0.03125, %v4005_v22 }
0x1eef   :  { %v4012_v48 = vmax.f32 %v4010_v21, 1e-10 }
0x1ef0   :  { %v4011_v24 = vmax.f32 %v4009_v23, 1e-10 }
0x1ef1   :  { %v4020_v25 = vadd.f32 1e-10, %v4012_v48 }
0x1ef2   :  { %v4019_v18 = vadd.f32 1e-10, %v4011_v24 }
0x1ef3   :  { %5005 = vrsqrt.f32 %v4020_v25 }
0x1ef4   :  { %5007 = vrsqrt.f32 %v4019_v18 }
0x1efd   :  { %v5006_v17 = vpop.eup %5005 }
0x1efe   :  { %v5008_v54 = vpop.eup %5007  ;;  %v4024_v33 = vmul.f32 %v5006_v17, %v4018_v28 }
0x1eff   :  { %v4023_v8 = vmul.f32 %v5008_v54, %v4017_v29 }
0x1f00   :  { %v4030_v30 = vadd.f32 %v4028_v20, %v4024_v33 }
0x1f01   :  { %v4029_v32 = vadd.f32 %v4028_v20, %v4023_v8 }
0x1f03   :  { %4801 = vmatprep.mubr.msk.f32.mxu1 %vm200_vm3, %v4029_v32 }
0x1f04   :  { %4802 = vmatmul.mubr.msk.f32.vlgmr.msra.gmra.mrb[50].mxu1 %vm200_vm3, %v4030_v30 }
0x1fd7   :  { %v4803_v35 = vpop.f32.mrb[50].mxu1 }
0x1fd8   :  { %v4115_v36 = vadd.f32 %v4803_v35, %v4374_v62  ;;  %v4109_v39 = vpop.f32.mrb[51].mxu1 }
0x1fd9   :  { %v4110_v6 = vadd.f32 %v4374_v62, %v4109_v39 }
0x1fda   :  { %v4119_v41 = vmax.f32 %v4115_v36, 0.0 }
0x1fdb   :  { %v4118_v40 = vmax.f32 %v4110_v6, 0.0 }
0x1fdd   :  { %4820 = vmatprep.mubr.msk.f32.mxu0 %vm71_vm0, %v4118_v40 }
0x1fde   :  { %4821 = vmatmul.mubr.msk.f32.vlgmr.msra.gmra.mrb[28].mxu0 %vm71_vm0, %v4119_v41 }
0x20b1   :  { %v4822_v46 = vpop.f32.mrb[28].mxu0 }
0x20b2   :  { %v4204_v47 = vadd.f32 %v4822_v46, %v4377_v43  ;;  %v4198_v49 = vpop.f32.mrb[29].mxu0 }
0x20b3   :  { %v4199_v50 = vadd.f32 %v4377_v43, %v4198_v49 }
0x20b4   :  { %v4208_v51 = vadd.f32 %v4204_v47, %v4030_v30 }
0x20b5   :  { %v4207_v53 = vadd.f32 %v4199_v50, %v4029_v32 }
0x20b6   :  { %v4212_v55 = vsel %vm200_vm3, %v4208_v51, 0.0 }
0x20b7   :  { %4213 = vadd.xlane.f32.xlu0 %v4212_v55  ;;  %v4209_v57 = vsel %vm200_vm3, %v4207_v53, 0.0 }
0x20b8   :  { %4210 = vadd.xlane.f32.xlu1 %v4209_v57 }
0x2144   :  { %v4214_v59 = vpop.xlane.xlu0 %4213 }
0x2145   :  { %v4216_v61 = vmul.f32 0.03125, %v4214_v59  ;;  %v4211_v63 = vpop.xlane.xlu1 %4210 }
0x2146   :  { %v4215_v0 = vmul.f32 0.03125, %v4211_v63 }
0x2147   :  { %v4218_v52 = vsub.f32 %v4208_v51, %v4216_v61 }
0x2148   :  { %v4217_v1 = vsub.f32 %v4207_v53, %v4215_v0 }
0x2149   :  { %v4220_v45 = vmul.f32 %v4218_v52, %v4218_v52  ;;  %v4236_v13 = vmul.f32 %v4234_v12, %v4218_v52 }
0x214a   :  { %v4219_v4 = vmul.f32 %v4217_v1, %v4217_v1  ;;  %v4235_v16 = vmul.f32 %v4234_v12, %v4217_v1 }
0x214b   :  { %v4224_v37 = vsel %vm200_vm3, %v4220_v45, 0.0 }
0x214c   :  { %4225 = vadd.xlane.f32.xlu0 %v4224_v37  ;;  %v4221_v2 = vsel %vm200_vm3, %v4219_v4, 0.0 }
0x214d   :  { %4222 = vadd.xlane.f32.xlu1 %v4221_v2 }
0x21d9   :  { %v4226_v3 = vpop.xlane.xlu0 %4225 }
0x21da   :  { %v4228_v60 = vmul.f32 0.03125, %v4226_v3  ;;  %v4223_v5 = vpop.xlane.xlu1 %4222 }
0x21db   :  { %v4227_v7 = vmul.f32 0.03125, %v4223_v5 }
0x21dc   :  { %v4230_v9 = vmax.f32 %v4228_v60, 1e-10 }
0x21dd   :  { %v4229_v10 = vmax.f32 %v4227_v7, 1e-10 }
0x21de   :  { %v4238_v38 = vadd.f32 1e-10, %v4230_v9 }
0x21df   :  { %v4237_v11 = vadd.f32 1e-10, %v4229_v10 }
0x21e0   :  { %5009 = vrsqrt.f32 %v4238_v38 }
0x21e1   :  { %5011 = vrsqrt.f32 %v4237_v11 }
0x21ea   :  { %v5010_v15 = vpop.eup %5009 }
0x21eb   :  { %v5012_v19 = vpop.eup %5011  ;;  %v4242_v21 = vmul.f32 %v5010_v15, %v4236_v13 }
0x21ec   :  { %v4241_v22 = vmul.f32 %v5012_v19, %v4235_v16 }
0x21ed   :  { %v4248_v23 = vadd.f32 %v4246_v14, %v4242_v21 }
0x21ee   :  { %v4247_v48 = vadd.f32 %v4246_v14, %v4241_v22 }
0x21ef   :  { %4250 = vst.msk [vmem:[#allocation2 + $0x8] sm:$0xff] %vm200_vm3, %v4248_v23 }
0x21f0   :  { %4249 = vst.msk [vmem:[#allocation2] sm:$0xff] %vm200_vm3, %v4247_v48 }
0x21f1   :  { %5024 = shalt.err (!%p5021_p4)
}
0x21f2   :  { %s5025_s16 = scalar_lea.hbm %s5768_s13, 256 }
0x21f3   :  { %p5026_p5 = scmp.ne.s32.totalorder %s5768_s13, %s5025_s16  ;;  %p5029_p6 = scmp.lt.u32.totalorder %s5025_s16, %s5768_s13 }
0x21f5   :  { %p5031_p7 = pnand %p5029_p6, %p5026_p5 }
0x21f7   :  { %5034 = shalt.err (!%p5031_p7)
}
0x21f8   :  { %s5052_s1 = smov 128   ;;  %s5053_s23 = smov 8  }
0x21f9   :  { %4262 = dma.vmem_to_hbm [thread:$0]  %s4257_s10, 256, %s5768_s13, [#allocation3], %s5052_s1, %s5052_s1, %s5053_s23  }
0x21fa   :  { %5035 = dma.done.wait [#allocation3], 256  }
0x21fb   :  { %5036 = vsyncadd [#allocation3], 4294967040 }
0x21fc   :  { %4266 = vsyncpa [#allocation3], 1 }

</bundles_post_ra>
